<compile_context>
chip_gen: v7x
topology: tpu7x:2x2x1
jax: 0.10.0
libtpu: 0.0.40
codegen_flags: <defaults>
</compile_context>

<pallas_src>
import jax
import jax.numpy as jnp
import numpy as np
from jax.experimental import pallas as pl
from jax.experimental.pallas import tpu as pltpu


# ----------------------------- VMEM / tiling heuristics -----------------------------

def _vmem_limit_bytes():
    """Generation-aware scoped-VMEM limit (v7x: 64 MiB/TC, v5e/v6e: 128 MiB)."""
    cap = 64 * 1024 * 1024
    try:
        info = pltpu.get_tpu_info()
        cap = int(getattr(info, "vmem_capacity_bytes", cap))
    except Exception:  # interpret mode / non-TPU backend
        pass
    return max(32 * 1024 * 1024, min((cap * 3) // 4, 96 * 1024 * 1024))


def _choose_tile_h(H, W, Kp, Cout, vmem_limit):
    """Row-tile height: double-buffered bf16 input+output blocks fit in ~60% of VMEM; TH | H."""
    row_bytes = 2 * W * (Kp + Cout)            # bf16 input row + bf16 output row
    budget = (vmem_limit * 6 // 10) // 2       # / 2 for double buffering
    th = max(1, min(H, budget // max(row_bytes, 1)))
    while H % th:
        th -= 1
    return th


def _choose_chunk(TH, W, Cout, live_f32_budget=128 * 1024):
    """Rows per in-kernel sub-chunk: live f32 state <= ~32 vregs; chunk | TH."""
    rows = max(1, live_f32_budget // (4 * W * Cout))
    c = max(1, min(TH, rows))
    while TH % c:
        c -= 1
    return c


# ----------------------------- conv3x3 + bias + ReLU -----------------------------

def _make_conv_kernel(NT, TH, W, Kp, Cout, chunk):
    n_chunks = TH // chunk

    def kernel(x_ref, w_ref, b_ref, o_ref):
        # x_ref: (1, 1, TH + NT - 1, W, Kp) bf16 (dx taps pre-stacked into Kp; NT dy taps as row shifts)
        # w_ref: (NT, Kp, Cout) bf16;  b_ref: (1, Cout) f32;  o_ref: (1, TH, W, Cout) bf16
        bias = b_ref[...]  # hoisted; broadcasts over (chunk*W, Cout)

        def do_chunk(r0):
            acc = jnp.zeros((chunk * W, Cout), dtype=jnp.float32)
            for t in range(NT):  # static unroll: NT in {1, 3}; H-aligned slices, no sublane shuffles
                patch = x_ref[0, 0, pl.ds(r0 + t, chunk), :, :].reshape(chunk * W, Kp)
                acc = acc + jnp.dot(patch, w_ref[t], preferred_element_type=jnp.float32)
            acc = jnp.maximum(acc + bias, 0.0)  # bias + ReLU in f32
            o_ref[0, pl.ds(r0, chunk), :, :] = acc.reshape(chunk, W, Cout).astype(o_ref.dtype)

        if n_chunks <= 8:
            for i in range(n_chunks):            # short trip count: static unroll
                do_chunk(i * chunk)
        else:
            def body(i, carry):
                do_chunk(pl.multiple_of(i * chunk, chunk))
                return carry
            jax.lax.fori_loop(0, n_chunks, body, 0)

    return kernel


def conv3x3_relu(x, w, b):
    """SAME 3x3 conv + bias + ReLU.

    x: (N, H, W, Cin) NHWC (any float dtype); w: (3, 3, Cin, Cout) f32; b: (Cout,) f32.
    Returns (N, H, W, Cout) bf16.  MXU runs in bf16 with f32 accumulation.
    """
    N, H, W, Cin = x.shape
    Cout = w.shape[-1]
    x = x.astype(jnp.bfloat16)

    if 9 * Cin <= 64:
        # Tiny-Cin path (first layer): full im2col -> ONE matmul with K = 9*Cin (27 -> 32).
        NT = 1
        K = 9 * Cin
        Kp = -(-K // 8) * 8
        xpad = jnp.pad(x, ((0, 0), (1, 1), (1, 1), (0, 0)))
        taps = [xpad[:, dy:dy + H, dx:dx + W, :] for dy in range(3) for dx in range(3)]
        xs = jnp.concatenate(taps, axis=-1)                  # (N, H, W, 9*Cin)
        if Kp != K:
            xs = jnp.pad(xs, ((0, 0), (0, 0), (0, 0), (0, Kp - K)))
        wk = w.reshape(9 * Cin, Cout)                        # (dy, dx, cin) row-major matches tap order
        if Kp != K:
            wk = jnp.pad(wk, ((0, Kp - K), (0, 0)))
        wt = wk.reshape(1, Kp, Cout)
    else:
        # General path: stack the 3 dx shifts along channels -> K = 3*Cin, 3 dy matmuls.
        # TODO(synk): on v6e/v7x, merging the dy taps along the MXU N dimension
        # ((Kp, 3*Cout) weights + shift-and-add) and lane-dense 128-wide output packing
        # for the Cout=64 layers would raise MXU/store utilization further; kept as the
        # simpler 3-matmul form for robustness.
        NT = 3
        Kp = 3 * Cin
        xpad = jnp.pad(x, ((0, 0), (1, 1), (1, 1), (0, 0)))            # (N, H+2, W+2, Cin)
        xs = jnp.concatenate([xpad[:, :, dx:dx + W, :] for dx in range(3)], axis=-1)  # (N, H+2, W, 3*Cin)
        wt = w.reshape(3, 3 * Cin, Cout)                     # wt[dy, dx*Cin + c, co] = w[dy, dx, c, co]

    vmem_limit = _vmem_limit_bytes()
    TH = _choose_tile_h(H, W, Kp, Cout, vmem_limit)
    chunk = _choose_chunk(TH, W, Cout)
    Hb = H // TH
    THp = TH + NT - 1

    # Explicit overlapping row windows (halo of NT-1 rows) so plain Blocked specs work.
    # With VMEM-sized TH the (TH+2)/TH duplication is a few percent (vs 3x at TH=1 before).
    if NT == 1:
        xw = xs.reshape(N, Hb, TH, W, Kp)
    else:
        xw = jnp.stack([xs[:, i * TH:i * TH + THp] for i in range(Hb)], axis=1)

    wt = wt.astype(jnp.bfloat16)
    b2 = b.reshape(1, Cout).astype(jnp.float32)

    kernel = _make_conv_kernel(NT, TH, W, Kp, Cout, chunk)
    return pl.pallas_call(
        kernel,
        out_shape=jax.ShapeDtypeStruct((N, H, W, Cout), jnp.bfloat16),
        grid_spec=pltpu.PrefetchScalarGridSpec(
            num_scalar_prefetch=0,
            grid=(N, Hb),
            in_specs=[
                pl.BlockSpec((1, 1, THp, W, Kp), lambda n, i: (n, i, 0, 0, 0)),
                pl.BlockSpec((NT, Kp, Cout), lambda n, i: (0, 0, 0)),
                pl.BlockSpec((1, Cout), lambda n, i: (0, 0)),
            ],
            out_specs=pl.BlockSpec((1, TH, W, Cout), lambda n, i: (n, i, 0, 0)),
        ),
        compiler_params=pltpu.CompilerParams(
            dimension_semantics=("parallel", "parallel"),
            vmem_limit_bytes=vmem_limit,
        ),
    )(xw, wt, b2)


# ----------------------------- 2x2 / stride-2 max pool -----------------------------

def maxpool2x2(x):
    """(N,H,W,C) -> (N,H//2,W//2,C), kernel 2x2, stride 2 (floors odd H/W like PyTorch).

    Wrapper-level strided maxima so XLA fuses it with the pad + dx-stack pass feeding
    the following conv; no separate Pallas pass / transpose copy.
    """
    N, H, W, C = x.shape
    Ho, Wo = H // 2, W // 2
    x = x[:, :2 * Ho, :2 * Wo, :]
    return jnp.maximum(
        jnp.maximum(x[:, 0::2, 0::2, :], x[:, 0::2, 1::2, :]),
        jnp.maximum(x[:, 1::2, 0::2, :], x[:, 1::2, 1::2, :]))


# ----------------------------- Vgg19 / VGGLoss -----------------------------

# (Cin, Cout) of the 5 convs inside slices 1..5 of VGG19.features[0:12]
VGG_SLICE_CHANNELS = [(3, 64), (64, 64), (64, 128), (128, 128), (128, 256)]
_POOL_BEFORE = (False, False, True, False, True)


def init_vgg19_params(key):
    params = []
    for i, (cin, cout) in enumerate(VGG_SLICE_CHANNELS):
        kw, kb = jax.random.split(jax.random.fold_in(key, i))
        w = jax.random.normal(kw, (3, 3, cin, cout), jnp.float32) * np.sqrt(2.0 / (9 * cin))
        b = 0.01 * jax.random.normal(kb, (cout,), jnp.float32)
        params.append((w, b))
    return params


def vgg19_features(x_nhwc, params):
    """Pallas path. x: (N,H,W,3). Returns [h_relu1..h_relu5] as bf16 NHWC feature maps."""
    (w1, b1), (w2, b2), (w3, b3), (w4, b4), (w5, b5) = params
    h1 = conv3x3_relu(x_nhwc, w1, b1)              # slice1
    h2 = conv3x3_relu(h1, w2, b2)                  # slice2
    h3 = conv3x3_relu(maxpool2x2(h2), w3, b3)      # slice3
    h4 = conv3x3_relu(h3, w4, b4)                  # slice4
    h5 = conv3x3_relu(maxpool2x2(h4), w5, b5)      # slice5
    return [h1, h2, h3, h4, h5]


def vgg19_forward(x_nchw, params):
    """PyTorch-style API: NCHW in, list of NCHW (f32) feature maps out."""
    x = jnp.transpose(x_nchw, (0, 2, 3, 1)).astype(jnp.float32)
    return [jnp.transpose(h, (0, 3, 1, 2)).astype(jnp.float32)
            for h in vgg19_features(x, params)]


def vgg_loss(x_nchw, y_nchw, params, weights=(1.0, 1.0, 1.0, 1.0, 1.0)):
    """VGGLoss.forward: weighted sum of per-slice L1 losses (y features detached)."""
    if x_nchw.shape[1] == 1 and y_nchw.shape[1] == 1:
        x_nchw = jnp.repeat(x_nchw, 3, axis=1)
        y_nchw = jnp.repeat(y_nchw, 3, axis=1)
    n = x_nchw.shape[0]
    xy = jnp.concatenate([x_nchw, y_nchw], axis=0)             # one batched VGG pass
    h = jnp.transpose(xy, (0, 2, 3, 1)).astype(jnp.float32)
    feats = vgg19_features(h, params)
    loss = 0.0
    for wgt, f in zip(weights, feats):
        a = f[:n].astype(jnp.float32)
        b = jax.lax.stop_gradient(f[n:]).astype(jnp.float32)
        loss = loss + wgt * jnp.mean(jnp.abs(a - b))
    return loss


# ----------------------------- pure-JAX references -----------------------------

def _conv_ref(h, w, b):
    y = jax.lax.conv_general_dilated(
        h.astype(jnp.bfloat16), w.astype(jnp.bfloat16), (1, 1), "SAME",
        dimension_numbers=("NHWC", "HWIO", "NHWC"),
        preferred_element_type=jnp.float32)
    return jnp.maximum(y + b.astype(jnp.float32), 0.0).astype(jnp.bfloat16)


def _pool_ref(h):
    return jax.lax.reduce_window(h, jnp.array(-jnp.inf, h.dtype), jax.lax.max,
                                 (1, 2, 2, 1), (1, 2, 2, 1), "VALID")


def vgg19_features_ref(x_nhwc, params):
    (w1, b1), (w2, b2), (w3, b3), (w4, b4), (w5, b5) = params
    h1 = _conv_ref(x_nhwc, w1, b1)
    h2 = _conv_ref(h1, w2, b2)
    h3 = _conv_ref(_pool_ref(h2), w3, b3)
    h4 = _conv_ref(h3, w4, b4)
    h5 = _conv_ref(_pool_ref(h4), w5, b5)
    return [h1, h2, h3, h4, h5]


def vgg_loss_ref(x_nchw, y_nchw, params, weights=(1.0, 1.0, 1.0, 1.0, 1.0)):
    if x_nchw.shape[1] == 1 and y_nchw.shape[1] == 1:
        x_nchw = jnp.repeat(x_nchw, 3, axis=1)
        y_nchw = jnp.repeat(y_nchw, 3, axis=1)
    n = x_nchw.shape[0]
    xy = jnp.concatenate([x_nchw, y_nchw], axis=0)
    h = jnp.transpose(xy, (0, 2, 3, 1)).astype(jnp.float32)
    feats = vgg19_features_ref(h, params)
    loss = 0.0
    for wgt, f in zip(weights, feats):
        a = f[:n].astype(jnp.float32)
        b = jax.lax.stop_gradient(f[n:]).astype(jnp.float32)
        loss = loss + wgt * jnp.mean(jnp.abs(a - b))
    return loss


def _apply_slice(k, h, params, conv_fn, pool_fn):
    """Apply slice k (optional pool + conv3x3+ReLU) to an NHWC input."""
    w, b = params[k]
    if _POOL_BEFORE[k]:
        h = pool_fn(h)
    return conv_fn(h, w, b)


if __name__ == "__main__":
    key = jax.random.PRNGKey(0)
    params = init_vgg19_params(jax.random.fold_in(key, 123))

    # Small NCHW inputs (batch=2, 3 channels as VGG's first conv requires, 32x32 spatial)
    x = jax.random.normal(jax.random.fold_in(key, 7), (2, 3, 32, 32), jnp.float32)
    y = jax.random.normal(jax.random.fold_in(key, 8), (2, 3, 32, 32), jnp.float32)

    # Per-layer check: feed the SAME (Pallas-produced) input to both the Pallas slice
    # and the XLA reference slice, so single-layer numerics are compared and bf16
    # rounding differences do not cascade across the 5 stacked convs.
    expected_shapes = [(2, 32, 32, 64), (2, 32, 32, 64), (2, 16, 16, 128),
                       (2, 16, 16, 128), (2, 8, 8, 256)]
    h = jnp.transpose(x, (0, 2, 3, 1)).astype(jnp.bfloat16)
    for k in range(5):
        run_pallas = jax.jit(lambda hh, kk=k: _apply_slice(kk, hh, params, conv3x3_relu, maxpool2x2))
        run_ref = jax.jit(lambda hh, kk=k: _apply_slice(kk, hh, params, _conv_ref, _pool_ref))
        o = jax.block_until_ready(run_pallas(h))
        r = jax.block_until_ready(run_ref(h))
        assert o.shape == expected_shapes[k] and r.shape == expected_shapes[k], (k, o.shape, r.shape)
        np.testing.assert_allclose(np.asarray(o, np.float32), np.asarray(r, np.float32),
                                   rtol=2e-2, atol=2e-2)
        h = o  # chain on the Pallas output

    # Full VGGLoss check (mean over large feature maps; cascade averages out).
    loss = jax.block_until_ready(jax.jit(vgg_loss)(x, y, params))
    loss_ref = jax.block_until_ready(jax.jit(vgg_loss_ref)(x, y, params))
    np.testing.assert_allclose(float(loss), float(loss_ref), rtol=2e-2, atol=1e-3)

    print("KERNEL_OK")
</pallas_src>

<mosaic_0001>
module attributes {stable_mosaic.version = 11 : i64} {
  func.func @kernel(%arg0: i32, %arg1: i32, %arg2: memref<1x1x32x32x32xbf16, #tpu.memory_space<vmem>>, %arg3: memref<1x32x64xbf16, #tpu.memory_space<vmem>>, %arg4: memref<1x64xf32, #tpu.memory_space<vmem>>, %arg5: memref<1x32x32x64xbf16, #tpu.memory_space<vmem>>) attributes {dimension_semantics = [#tpu.dimension_semantics<parallel>, #tpu.dimension_semantics<parallel>], iteration_bounds = array<i64: 2, 1>, scalar_prefetch = 0 : i64, scratch_operands = 0 : i64, tpu.core_type = #tpu.core_type<tc>, window_params = [{transform_indices = @transform_0, window_bounds = array<i64: 1, 1, 32, 32, 32>}, {pipeline_mode = #tpu.pipeline_mode<synchronous>, transform_indices = @transform_1, window_bounds = array<i64: 1, 32, 64>}, {pipeline_mode = #tpu.pipeline_mode<synchronous>, transform_indices = @transform_2, window_bounds = array<i64: 1, 64>}, {transform_indices = @transform_3, window_bounds = array<i64: 1, 32, 32, 64>}]} {
    %c0 = arith.constant 0 : index
    %c0_0 = arith.constant 0 : index
    %0 = vector.load %arg4[%c0, %c0_0] : memref<1x64xf32, #tpu.memory_space<vmem>>, vector<1x64xf32>
    %cst = arith.constant 0.000000e+00 : f32
    %1 = vector.broadcast %cst : f32 to vector<512x64xf32>
    %c0_1 = arith.constant 0 : index
    %c0_2 = arith.constant 0 : index
    %c0_3 = arith.constant 0 : index
    %c0_4 = arith.constant 0 : index
    %c0_5 = arith.constant 0 : index
    %2 = vector.load %arg2[%c0_1, %c0_2, %c0_3, %c0_4, %c0_5] : memref<1x1x32x32x32xbf16, #tpu.memory_space<vmem>>, vector<1x1x16x32x32xbf16>
    %3 = vector.shape_cast %2 : vector<1x1x16x32x32xbf16> to vector<16x32x32xbf16>
    %4 = vector.shape_cast %3 : vector<16x32x32xbf16> to vector<512x32xbf16>
    %c0_6 = arith.constant 0 : index
    %c0_7 = arith.constant 0 : index
    %c0_8 = arith.constant 0 : index
    %5 = vector.load %arg3[%c0_6, %c0_7, %c0_8] : memref<1x32x64xbf16, #tpu.memory_space<vmem>>, vector<1x32x64xbf16>
    %6 = vector.shape_cast %5 : vector<1x32x64xbf16> to vector<32x64xbf16>
    %cst_9 = arith.constant dense<0.000000e+00> : vector<512x64xf32>
    %7 = tpu.matmul %4, %6, %cst_9 {dimension_numbers = #tpu.dot_dimension_numbers<[1], [0], [0], [1], [0, 0, 1, 1], [], []>} : vector<512x32xbf16>, vector<32x64xbf16>, vector<512x64xf32> -> vector<512x64xf32>
    %8 = arith.addf %1, %7 : vector<512x64xf32>
    %9 = vector.broadcast %0 : vector<1x64xf32> to vector<512x64xf32>
    %10 = arith.addf %8, %9 : vector<512x64xf32>
    %cst_10 = arith.constant 0.000000e+00 : f32
    %11 = vector.broadcast %cst_10 : f32 to vector<512x64xf32>
    %12 = arith.maximumf %10, %11 : vector<512x64xf32>
    %13 = vector.shape_cast %12 : vector<512x64xf32> to vector<16x32x64xf32>
    %14 = arith.truncf %13 : vector<16x32x64xf32> to vector<16x32x64xbf16>
    %c0_11 = arith.constant 0 : index
    %c0_12 = arith.constant 0 : index
    %c0_13 = arith.constant 0 : index
    %c0_14 = arith.constant 0 : index
    %15 = vector.load %arg5[%c0_11, %c0_12, %c0_13, %c0_14] : memref<1x32x32x64xbf16, #tpu.memory_space<vmem>>, vector<1x16x32x64xbf16>
    %16 = vector.shape_cast %15 : vector<1x16x32x64xbf16> to vector<16x32x64xbf16>
    %17 = vector.shape_cast %14 : vector<16x32x64xbf16> to vector<1x16x32x64xbf16>
    tpu.vector_store %arg5[%c0_11, %c0_12, %c0_13, %c0_14], %17 {strides = array<i32>} : memref<1x32x32x64xbf16, #tpu.memory_space<vmem>>, vector<1x16x32x64xbf16>,
    %cst_15 = arith.constant 0.000000e+00 : f32
    %18 = vector.broadcast %cst_15 : f32 to vector<512x64xf32>
    %c0_16 = arith.constant 0 : index
    %c0_17 = arith.constant 0 : index
    %c16 = arith.constant 16 : index
    %c0_18 = arith.constant 0 : index
    %c0_19 = arith.constant 0 : index
    %19 = vector.load %arg2[%c0_16, %c0_17, %c16, %c0_18, %c0_19] : memref<1x1x32x32x32xbf16, #tpu.memory_space<vmem>>, vector<1x1x16x32x32xbf16>
    %20 = vector.shape_cast %19 : vector<1x1x16x32x32xbf16> to vector<16x32x32xbf16>
    %21 = vector.shape_cast %20 : vector<16x32x32xbf16> to vector<512x32xbf16>
    %c0_20 = arith.constant 0 : index
    %c0_21 = arith.constant 0 : index
    %c0_22 = arith.constant 0 : index
    %22 = vector.load %arg3[%c0_20, %c0_21, %c0_22] : memref<1x32x64xbf16, #tpu.memory_space<vmem>>, vector<1x32x64xbf16>
    %23 = vector.shape_cast %22 : vector<1x32x64xbf16> to vector<32x64xbf16>
    %cst_23 = arith.constant dense<0.000000e+00> : vector<512x64xf32>
    %24 = tpu.matmul %21, %23, %cst_23 {dimension_numbers = #tpu.dot_dimension_numbers<[1], [0], [0], [1], [0, 0, 1, 1], [], []>} : vector<512x32xbf16>, vector<32x64xbf16>, vector<512x64xf32> -> vector<512x64xf32>
    %25 = arith.addf %18, %24 : vector<512x64xf32>
    %26 = vector.broadcast %0 : vector<1x64xf32> to vector<512x64xf32>
    %27 = arith.addf %25, %26 : vector<512x64xf32>
    %cst_24 = arith.constant 0.000000e+00 : f32
    %28 = vector.broadcast %cst_24 : f32 to vector<512x64xf32>
    %29 = arith.maximumf %27, %28 : vector<512x64xf32>
    %30 = vector.shape_cast %29 : vector<512x64xf32> to vector<16x32x64xf32>
    %31 = arith.truncf %30 : vector<16x32x64xf32> to vector<16x32x64xbf16>
    %c0_25 = arith.constant 0 : index
    %c16_26 = arith.constant 16 : index
    %c0_27 = arith.constant 0 : index
    %c0_28 = arith.constant 0 : index
    %32 = vector.load %arg5[%c0_25, %c16_26, %c0_27, %c0_28] : memref<1x32x32x64xbf16, #tpu.memory_space<vmem>>, vector<1x16x32x64xbf16>
    %33 = vector.shape_cast %32 : vector<1x16x32x64xbf16> to vector<16x32x64xbf16>
    %34 = vector.shape_cast %31 : vector<16x32x64xbf16> to vector<1x16x32x64xbf16>
    tpu.vector_store %arg5[%c0_25, %c16_26, %c0_27, %c0_28], %34 {strides = array<i32>} : memref<1x32x32x64xbf16, #tpu.memory_space<vmem>>, vector<1x16x32x64xbf16>,
    return
  }
  func.func @transform_0(%arg0: i32, %arg1: i32) -> (i32, i32, i32, i32, i32) {
    %c0_i32 = arith.constant 0 : i32
    %c0_i32_0 = arith.constant 0 : i32
    %c0_i32_1 = arith.constant 0 : i32
    %c0_i32_2 = arith.constant 0 : i32
    return %arg0, %arg1, %c0_i32, %c0_i32_0, %c0_i32_1 : i32, i32, i32, i32, i32
  }
  func.func @transform_1(%arg0: i32, %arg1: i32) -> (i32, i32, i32) {
    %c0_i32 = arith.constant 0 : i32
    %c0_i32_0 = arith.constant 0 : i32
    %c0_i32_1 = arith.constant 0 : i32
    %c0_i32_2 = arith.constant 0 : i32
    return %c0_i32, %c0_i32_0, %c0_i32_1 : i32, i32, i32
  }
  func.func @transform_2(%arg0: i32, %arg1: i32) -> (i32, i32) {
    %c0_i32 = arith.constant 0 : i32
    %c0_i32_0 = arith.constant 0 : i32
    %c0_i32_1 = arith.constant 0 : i32
    return %c0_i32, %c0_i32_0 : i32, i32
  }
  func.func @transform_3(%arg0: i32, %arg1: i32) -> (i32, i32, i32, i32) {
    %c0_i32 = arith.constant 0 : i32
    %c0_i32_0 = arith.constant 0 : i32
    %c0_i32_1 = arith.constant 0 : i32
    return %arg0, %arg1, %c0_i32, %c0_i32_0 : i32, i32, i32, i32
  }
}

</mosaic_0001>

<bundles_post_ra>
// kernel: _lambda_.1
= control target key start
LH: loop header
LB: loop body
LE: loop exit
PB: predicated region body
PF: predicated region fallthrough
CT: control target
= control target key end

     0   :  { %8 = vsyncpa [#allocation3], 0  ;;  %s3950_s0 = inlined_call_operand.vmem [shape: bf16[2,1,32,32,32], index: 0, kind: input, shape index: {}]   ;;  %s3951_s1 = inlined_call_operand.vmem [shape: bf16[1,32,64], index: 1, kind: input, shape index: {}]   ;;  %s3952_s2 = inlined_call_operand.vmem [shape: f32[1,64], index: 2, kind: input, shape index: {}]   ;;  %s3953_s3 = inlined_call_operand.hbm [shape: bf16[2,32,32,64], index: 3, kind: output, shape index: {}]  }
   0x1   :  { %10 = vsyncpa [#allocation3 + $0x1], 0  ;;  %s3292_s12 = smov 0   ;;  %s3294_s13 = smov 0  }
   0x2   :  { %s3296_s14 = smov 0   ;;  %s3298_s15 = smov 0  }
   0x3   :  { %s3300_s16 = smov 0   ;;  %s3302_s17 = smov 0  }
   0x4 LB: > { %s2327_s18 = sadd.s32 4294967295, %s3267_s17   ;;  %s2328_s19 = sadd.s32 4294967294, %s3267_s17   ;;  %s3267_s17 = sphi %s3302_s17, %s16_s17   ;;  %s3263_s16 = sphi %s3300_s16, %s3960_s16   ;;  %s3259_s15 = sphi %s3298_s15, %s3959_s15   ;;  %s3255_s14 = sphi %s3296_s14, %s3958_s14   ;;  %s3251_s13 = sphi %s3294_s13, %s3957_s13   ;;  %s3247_s12 = sphi %s3292_s12, %s3956_s12  }
   0x5   : > { %s28_s20 = sadd.s32 1, %s3263_s16  ;;  %s107_s21 = sadd.s32 1, %s3255_s14 }
   0x6   : > { %p30_p0 = scmp.ge.s32.totalorder %s28_s20, 2  ;;  %p117_p1 = scmp.ne.s32.totalorder %s3255_s14, %s3251_s13 }
   0x7   : > { %p118_p2 = scmp.eq.s32.totalorder %s2327_s18, 1  ;;  %p123_p3 = scmp.ne.s32.totalorder %s3251_s13, %s3247_s12 }
   0x8   : > { %s3962_s20 = smov (%p30_p0, %s28_s20), 0  ;;  %p124_p5 = scmp.eq.s32.totalorder %s2328_s19, 1 }
   0x9   : > { %p3332_p4 = por %p118_p2, %p117_p1  ;;  %s102_s23 = ssub.s32 %s3263_s16, %s3962_s20 }
   0xa   : > { %p2331_p6 = scmp.ge.s32.totalorder %s3267_s17, 1  ;;  %p105_p7 = scmp.eq.s32.totalorder %s102_s23, 0 }
   0xb   : > { %p3339_p8 = por %p124_p5, %p123_p3  ;;  %p160_p9 = scmp.lt.s32.totalorder %s3267_s17, 3 }
   0xc   : > { %s3345_s25 = scalar_select %p105_p7, %s3255_s14, %s107_s21  }
   0xd   : > { %p161_p10 = pnand %p2331_p6, %p160_p9 }
   0xe   : > { %v3120_v0 = vld [vmem:[%s3951_s1] sm:$0xff] (!%p161_p10)   ;;  %p188_p11 = scmp.lt.s32.totalorder (!%p161_p10), %s3259_s15, 1  ;;  %v3122_v2 = vld [vmem:[%s3951_s1 + $0x8] sm:$0xff] (!%p161_p10)   ;;  %vm446_vm0 = vcmask (!%p161_p10), 261120   ;;  %s185_s18 = sand.u32 (!%p161_p10), 1, %s3251_s13   ;;  %vm1152_vm1 = vcmask (!%p161_p10), 519168  }
   0xf   : > { %164 = sbr.rel (%p161_p10) target bundleno = 385 (0x181), region = 32  ;;  %v3121_v1 = vld [vmem:[%s3951_s1] sm:$0xff] (!%p161_p10)   ;;  %2927 = vmatprep.subr.bf16.mxu0 (!%p161_p10), %v3120_v0  ;;  %v3123_v3 = vld [vmem:[%s3951_s1 + $0x8] sm:$0xff] (!%p161_p10)   ;;  %s2332_s23 = sshll.u32 (!%p161_p10), %s185_s18, 9 }
  0x10   : > { %2995 = vmatprep.subr.bf16.mxu1 (!%p161_p10), %v3121_v1  ;;  %2928 = vmatpush3.bf16.msra.mxu0 (!%p161_p10), %v3120_v0  ;;  %s3510_s26 = scalar_lea.vmem (!%p161_p10), [#allocation2], %s2332_s23  ;;  %s2858_s29 = sshll.u32 (!%p161_p10), %s3259_s15, 13 }
  0x11   : > { %2996 = vmatpush3.bf16.msra.mxu1 (!%p161_p10), %v3121_v1  ;;  %2929 = vmatprep.subr.bf16.mxu0 (!%p161_p10), %v3122_v2  ;;  %s2245_s30 = sshll.u32 (!%p161_p10), %s3510_s26, 4  ;;  %s3904_s6 = scalar_lea.sflag (!%p161_p10), [#allocation3], %s185_s18  ;;  %s3890_s30 = int_to_ptr.vmem [resolvable:$true] %s2245_s30 }
  0x12   : > { %2997 = vmatprep.subr.bf16.mxu1 (!%p161_p10), %v3123_v3  ;;  %s3189_s7 = scalar_lea.vmem (!%p161_p10), %s3890_s30, 8192 }
  0x13   : > { %p3190_p12 = scmp.ne.s32.totalorder (!%p161_p10), %s3890_s30, %s3189_s7 }
  0x14   : > { %2930 = vmatpush3.bf16.msra.mxu0 (!%p161_p10), %v3122_v2 }
  0x15   : > { %2998 = vmatpush3.bf16.msra.mxu1 (!%p161_p10), %v3123_v3  ;;  %p3191_p13 = pnand (!%p161_p10), %p3190_p12, %p3332_p4 }
  0x16   : > { %s189_s5 = scalar_select %p188_p11, %s3259_s15, 1 }
  0x17   : > { %p3192_p0 = pneg %p3191_p13 }
  0x18   : > { %s2729_s8 = sshll.u32 %s189_s5, 9  ;;  %s3888_s5 = scalar_lea.hbm %s3953_s3, %s2858_s29 }
  0x19   : > { %s3364_s11 = scalar_lea.vmem %s3950_s0, %s2729_s8  ;;  %s3269_s8 = smov [#allocation2]  }
  0x1a   : > { %v3124_v4 = vld [vmem:[%s3364_s11] sm:$0xff]   ;;  %v3126_v6 = vld [vmem:[%s3364_s11 + $0x8] sm:$0xff]   ;;  %v3128_v8 = vld [vmem:[%s3364_s11 + $0x10] sm:$0xff]   ;;  %s3193_s9 = sshll.u32 %s3269_s8, 4  ;;  %s3194_s9 = int_to_ptr.vmem [resolvable:$false] %s3193_s9 }
  0x1b   : > { %v3125_v5 = vld [vmem:[%s3364_s11 + $0x100] sm:$0xff]   ;;  %2931 = vmatprep.mubr.msk.bf16.mxu0 %vm446_vm0, %v3124_v4  ;;  %v3127_v7 = vld [vmem:[%s3364_s11 + $0x108] sm:$0xff]   ;;  %v3129_v9 = vld [vmem:[%s3364_s11 + $0x110] sm:$0xff]   ;;  %s3195_s10 = scalar_lea.vmem %s3194_s9, 16384  ;;  %p3196_p1 = scmp.lt.s32.totalorder %s3890_s30, %s3194_s9 }
  0x1c   : > { %2999 = vmatprep.mubr.msk.bf16.mxu1 %vm446_vm0, %v3125_v5  ;;  %2932 = vmatmul.mubr.msk.bf16.vlgmr.msra.gmra.mrb[0].mxu0 %vm446_vm0, %v3126_v6  ;;  %v3130_v10 = vld [vmem:[%s3364_s11 + $0x18] sm:$0xff]   ;;  %v3132_v12 = vld [vmem:[%s3364_s11 + $0x20] sm:$0xff]   ;;  %v3134_v14 = vld [vmem:[%s3364_s11 + $0x28] sm:$0xff]   ;;  %p3197_p2 = scmp.lt.s32.totalorder %s3195_s10, %s3189_s7 }
  0x1d   : > { %3000 = vmatmul.mubr.msk.bf16.vlgmr.msra.gmra.mrb[0].mxu1 %vm446_vm0, %v3127_v7  ;;  %2935 = vmatprep.mubr.msk.bf16.mxu0 %vm446_vm0, %v3128_v8  ;;  %v3131_v11 = vld [vmem:[%s3364_s11 + $0x118] sm:$0xff]   ;;  %v3133_v13 = vld [vmem:[%s3364_s11 + $0x120] sm:$0xff]   ;;  %v3135_v15 = vld [vmem:[%s3364_s11 + $0x128] sm:$0xff]  }
  0x1e   : > { %3003 = vmatprep.mubr.msk.bf16.mxu1 %vm446_vm0, %v3129_v9  ;;  %v3136_v16 = vld [vmem:[%s3364_s11 + $0x30] sm:$0xff]   ;;  %v3138_v18 = vld [vmem:[%s3364_s11 + $0x38] sm:$0xff]   ;;  %v3140_v20 = vld [vmem:[%s3364_s11 + $0x40] sm:$0xff]   ;;  %p3198_p3 = por %p3197_p2, %p3196_p1 }
  0x1f   : > { %v3137_v17 = vld [vmem:[%s3364_s11 + $0x130] sm:$0xff]   ;;  %v3139_v19 = vld [vmem:[%s3364_s11 + $0x138] sm:$0xff]   ;;  %v3141_v21 = vld [vmem:[%s3364_s11 + $0x140] sm:$0xff]  }
  0x20   : > { %v3142_v22 = vld [vmem:[%s3364_s11 + $0x48] sm:$0xff]   ;;  %v3144_v24 = vld [vmem:[%s3364_s11 + $0x50] sm:$0xff]   ;;  %v3146_v26 = vld [vmem:[%s3364_s11 + $0x58] sm:$0xff]   ;;  %p3199_p5 = pnand %p3198_p3, %p3192_p0 }
  0x21   : > { %v3143_v23 = vld [vmem:[%s3364_s11 + $0x148] sm:$0xff]   ;;  %v3145_v25 = vld [vmem:[%s3364_s11 + $0x150] sm:$0xff]   ;;  %v3147_v27 = vld [vmem:[%s3364_s11 + $0x158] sm:$0xff]  }
  0x22   : > { %v3148_v28 = vld [vmem:[%s3364_s11 + $0x60] sm:$0xff]   ;;  %v3150_v30 = vld [vmem:[%s3364_s11 + $0x68] sm:$0xff]   ;;  %v3152_v32 = vld [vmem:[%s3364_s11 + $0x70] sm:$0xff]  }
  0x23   : > { %v3149_v29 = vld [vmem:[%s3364_s11 + $0x160] sm:$0xff]   ;;  %v3151_v31 = vld [vmem:[%s3364_s11 + $0x168] sm:$0xff]   ;;  %v3153_v33 = vld [vmem:[%s3364_s11 + $0x170] sm:$0xff]  }
  0x24   : > { %2936 = vmatmul.mubr.msk.bf16.gmra.mrb[4].mxu0 %vm446_vm0, %v3130_v10  ;;  %v3154_v34 = vld [vmem:[%s3364_s11 + $0x78] sm:$0xff]   ;;  %v3156_v36 = vld [vmem:[%s3364_s11 + $0x80] sm:$0xff]   ;;  %v3158_v38 = vld [vmem:[%s3364_s11 + $0x88] sm:$0xff]  }
  0x25   : > { %3004 = vmatmul.mubr.msk.bf16.gmra.mrb[4].mxu1 %vm446_vm0, %v3131_v11  ;;  %2939 = vmatprep.mubr.msk.bf16.mxu0 %vm446_vm0, %v3132_v12  ;;  %v3155_v35 = vld [vmem:[%s3364_s11 + $0x178] sm:$0xff]   ;;  %v3157_v37 = vld [vmem:[%s3364_s11 + $0x180] sm:$0xff]   ;;  %v3159_v39 = vld [vmem:[%s3364_s11 + $0x188] sm:$0xff]  }
  0x26   : > { %3007 = vmatprep.mubr.msk.bf16.mxu1 %vm446_vm0, %v3133_v13  ;;  %v3160_v40 = vld [vmem:[%s3364_s11 + $0x90] sm:$0xff]   ;;  %v3162_v42 = vld [vmem:[%s3364_s11 + $0x98] sm:$0xff]   ;;  %v3164_v44 = vld [vmem:[%s3364_s11 + $0xa0] sm:$0xff]  }
  0x27   : > { %v3161_v41 = vld [vmem:[%s3364_s11 + $0x190] sm:$0xff]   ;;  %v3163_v43 = vld [vmem:[%s3364_s11 + $0x198] sm:$0xff]   ;;  %v3165_v45 = vld [vmem:[%s3364_s11 + $0x1a0] sm:$0xff]  }
  0x28   : > { %v3166_v46 = vld [vmem:[%s3364_s11 + $0xa8] sm:$0xff]   ;;  %v3168_v48 = vld [vmem:[%s3364_s11 + $0xb0] sm:$0xff]   ;;  %v3170_v50 = vld [vmem:[%s3364_s11 + $0xb8] sm:$0xff]  }
  0x29   : > { %v3167_v47 = vld [vmem:[%s3364_s11 + $0x1a8] sm:$0xff]   ;;  %v3169_v49 = vld [vmem:[%s3364_s11 + $0x1b0] sm:$0xff]   ;;  %v3171_v51 = vld [vmem:[%s3364_s11 + $0x1b8] sm:$0xff]  }
  0x2a   : > { %v3172_v52 = vld [vmem:[%s3364_s11 + $0xc0] sm:$0xff]   ;;  %v3174_v54 = vld [vmem:[%s3364_s11 + $0xc8] sm:$0xff]   ;;  %v3176_v56 = vld [vmem:[%s3364_s11 + $0xd0] sm:$0xff]  }
  0x2b   : > { %v3173_v53 = vld [vmem:[%s3364_s11 + $0x1c0] sm:$0xff]   ;;  %v3175_v55 = vld [vmem:[%s3364_s11 + $0x1c8] sm:$0xff]   ;;  %v3177_v57 = vld [vmem:[%s3364_s11 + $0x1d0] sm:$0xff]  }
  0x2c   : > { %2940 = vmatmul.mubr.msk.bf16.gmra.mrb[8].mxu0 %vm446_vm0, %v3134_v14  ;;  %v3178_v58 = vld [vmem:[%s3364_s11 + $0xd8] sm:$0xff]   ;;  %v3180_v60 = vld [vmem:[%s3364_s11 + $0xe0] sm:$0xff]   ;;  %v3182_v62 = vld [vmem:[%s3364_s11 + $0xe8] sm:$0xff]  }
  0x2d   : > { %3008 = vmatmul.mubr.msk.bf16.gmra.mrb[8].mxu1 %vm446_vm0, %v3135_v15  ;;  %2943 = vmatprep.mubr.msk.bf16.mxu0 %vm446_vm0, %v3136_v16  ;;  %v3179_v59 = vld [vmem:[%s3364_s11 + $0x1d8] sm:$0xff]   ;;  %v3181_v61 = vld [vmem:[%s3364_s11 + $0x1e0] sm:$0xff]   ;;  %v3183_v63 = vld [vmem:[%s3364_s11 + $0x1e8] sm:$0xff]  }
  0x2e   : > { %3011 = vmatprep.mubr.msk.bf16.mxu1 %vm446_vm0, %v3137_v17  ;;  %v3184_v0 = vld [vmem:[%s3364_s11 + $0xf0] sm:$0xff]   ;;  %v3186_v2 = vld [vmem:[%s3364_s11 + $0xf8] sm:$0xff]   ;;  %v3498_v4 = vld [vmem:[%s3952_s2] ss:$0 sm:$0xff] }
  0x2f   : > { %v3185_v1 = vld [vmem:[%s3364_s11 + $0x1f0] sm:$0xff]   ;;  %v3187_v3 = vld [vmem:[%s3364_s11 + $0x1f8] sm:$0xff]  }
  0x34   : > { %2944 = vmatmul.mubr.msk.bf16.gmra.mrb[12].mxu0 %vm446_vm0, %v3138_v18 }
  0x35   : > { %3012 = vmatmul.mubr.msk.bf16.gmra.mrb[12].mxu1 %vm446_vm0, %v3139_v19  ;;  %2947 = vmatprep.mubr.msk.bf16.mxu0 %vm446_vm0, %v3140_v20 }
  0x36   : > { %3015 = vmatprep.mubr.msk.bf16.mxu1 %vm446_vm0, %v3141_v21 }
  0x3c   : > { %2948 = vmatmul.mubr.msk.bf16.gmra.mrb[16].mxu0 %vm446_vm0, %v3142_v22 }
  0x3d   : > { %3016 = vmatmul.mubr.msk.bf16.gmra.mrb[16].mxu1 %vm446_vm0, %v3143_v23  ;;  %2951 = vmatprep.mubr.msk.bf16.mxu0 %vm446_vm0, %v3144_v24 }
  0x3e   : > { %3019 = vmatprep.mubr.msk.bf16.mxu1 %vm446_vm0, %v3145_v25 }
  0x44   : > { %2952 = vmatmul.mubr.msk.bf16.gmra.mrb[20].mxu0 %vm446_vm0, %v3146_v26 }
  0x45   : > { %3020 = vmatmul.mubr.msk.bf16.gmra.mrb[20].mxu1 %vm446_vm0, %v3147_v27  ;;  %2955 = vmatprep.mubr.msk.bf16.mxu0 %vm446_vm0, %v3148_v28 }
  0x46   : > { %3023 = vmatprep.mubr.msk.bf16.mxu1 %vm446_vm0, %v3149_v29 }
  0x4c   : > { %2956 = vmatmul.mubr.msk.bf16.gmra.mrb[24].mxu0 %vm446_vm0, %v3150_v30 }
  0x4d   : > { %3024 = vmatmul.mubr.msk.bf16.gmra.mrb[24].mxu1 %vm446_vm0, %v3151_v31  ;;  %2959 = vmatprep.mubr.msk.bf16.mxu0 %vm446_vm0, %v3152_v32 }
  0x4e   : > { %3027 = vmatprep.mubr.msk.bf16.mxu1 %vm446_vm0, %v3153_v33 }
  0x54   : > { %2960 = vmatmul.mubr.msk.bf16.gmra.mrb[28].mxu0 %vm446_vm0, %v3154_v34 }
  0x55   : > { %3028 = vmatmul.mubr.msk.bf16.gmra.mrb[28].mxu1 %vm446_vm0, %v3155_v35  ;;  %2963 = vmatprep.mubr.msk.bf16.mxu0 %vm446_vm0, %v3156_v36 }
  0x56   : > { %3031 = vmatprep.mubr.msk.bf16.mxu1 %vm446_vm0, %v3157_v37 }
  0x5c   : > { %2964 = vmatmul.mubr.msk.bf16.gmra.mrb[32].mxu0 %vm446_vm0, %v3158_v38 }
  0x5d   : > { %3032 = vmatmul.mubr.msk.bf16.gmra.mrb[32].mxu1 %vm446_vm0, %v3159_v39  ;;  %2967 = vmatprep.mubr.msk.bf16.mxu0 %vm446_vm0, %v3160_v40 }
  0x5e   : > { %3035 = vmatprep.mubr.msk.bf16.mxu1 %vm446_vm0, %v3161_v41 }
  0x64   : > { %2968 = vmatmul.mubr.msk.bf16.gmra.mrb[36].mxu0 %vm446_vm0, %v3162_v42 }
  0x65   : > { %3036 = vmatmul.mubr.msk.bf16.gmra.mrb[36].mxu1 %vm446_vm0, %v3163_v43  ;;  %2971 = vmatprep.mubr.msk.bf16.mxu0 %vm446_vm0, %v3164_v44 }
  0x66   : > { %3039 = vmatprep.mubr.msk.bf16.mxu1 %vm446_vm0, %v3165_v45 }
  0x6c   : > { %2972 = vmatmul.mubr.msk.bf16.gmra.mrb[40].mxu0 %vm446_vm0, %v3166_v46 }
  0x6d   : > { %3040 = vmatmul.mubr.msk.bf16.gmra.mrb[40].mxu1 %vm446_vm0, %v3167_v47  ;;  %2975 = vmatprep.mubr.msk.bf16.mxu0 %vm446_vm0, %v3168_v48 }
  0x6e   : > { %3043 = vmatprep.mubr.msk.bf16.mxu1 %vm446_vm0, %v3169_v49 }
  0x74   : > { %2976 = vmatmul.mubr.msk.bf16.gmra.mrb[44].mxu0 %vm446_vm0, %v3170_v50 }
  0x75   : > { %3044 = vmatmul.mubr.msk.bf16.gmra.mrb[44].mxu1 %vm446_vm0, %v3171_v51  ;;  %2979 = vmatprep.mubr.msk.bf16.mxu0 %vm446_vm0, %v3172_v52 }
  0x76   : > { %3047 = vmatprep.mubr.msk.bf16.mxu1 %vm446_vm0, %v3173_v53 }
  0x7c   : > { %2980 = vmatmul.mubr.msk.bf16.gmra.mrb[48].mxu0 %vm446_vm0, %v3174_v54 }
  0x7d   : > { %3048 = vmatmul.mubr.msk.bf16.gmra.mrb[48].mxu1 %vm446_vm0, %v3175_v55  ;;  %2983 = vmatprep.mubr.msk.bf16.mxu0 %vm446_vm0, %v3176_v56 }
  0x7e   : > { %3051 = vmatprep.mubr.msk.bf16.mxu1 %vm446_vm0, %v3177_v57 }
  0x84   : > { %2984 = vmatmul.mubr.msk.bf16.gmra.mrb[52].mxu0 %vm446_vm0, %v3178_v58 }
  0x85   : > { %3052 = vmatmul.mubr.msk.bf16.gmra.mrb[52].mxu1 %vm446_vm0, %v3179_v59  ;;  %2987 = vmatprep.mubr.msk.bf16.mxu0 %vm446_vm0, %v3180_v60 }
  0x86   : > { %3055 = vmatprep.mubr.msk.bf16.mxu1 %vm446_vm0, %v3181_v61 }
  0x8c   : > { %2988 = vmatmul.mubr.msk.bf16.gmra.mrb[56].mxu0 %vm446_vm0, %v3182_v62 }
  0x8d   : > { %3056 = vmatmul.mubr.msk.bf16.gmra.mrb[56].mxu1 %vm446_vm0, %v3183_v63  ;;  %2991 = vmatprep.mubr.msk.bf16.mxu0 %vm446_vm0, %v3184_v0 }
  0x8e   : > { %3059 = vmatprep.mubr.msk.bf16.mxu1 %vm446_vm0, %v3185_v1 }
  0x94   : > { %2992 = vmatmul.mubr.msk.bf16.gmra.mrb[60].mxu0 %vm446_vm0, %v3186_v2 }
  0x95   : > { %3060 = vmatmul.mubr.msk.bf16.gmra.mrb[60].mxu1 %vm446_vm0, %v3187_v3 }
  0xef   : > { %v2933_v5 = vpop.f32.mrb[0].mxu0 }
  0xf0   : > { %v586_v6 = vadd.f32 %v2933_v5, %v3498_v4  ;;  %v3001_v7 = vpop.f32.mrb[0].mxu1  ;;  %v577_v8 = vpop.f32.mrb[1].mxu0 }
  0xf1   : > { %v1597_v9 = vadd.f32 %v3001_v7, %v3498_v4  ;;  %v578_v10 = vadd.f32 %v3498_v4, %v577_v8  ;;  %v1588_v11 = vpop.f32.mrb[1].mxu1  ;;  %v2934_v12 = vpop.f32.mrb[2].mxu0 }
  0xf2   : > { %v834_v13 = vmax.f32 %v586_v6, 0.0  ;;  %v1589_v14 = vadd.f32 %v3498_v4, %v1588_v11  ;;  %v589_v15 = vadd.f32 %v2934_v12, %v3498_v4  ;;  %v3002_v16 = vpop.f32.mrb[2].mxu1  ;;  %v580_v17 = vpop.f32.mrb[3].mxu0 }
  0xf3   : > { %v1845_v18 = vmax.f32 %v1597_v9, 0.0  ;;  %v832_v19 = vmax.f32 %v578_v10, 0.0  ;;  %v1600_v20 = vadd.f32 %v3002_v16, %v3498_v4  ;;  %v581_v21 = vadd.f32 %v3498_v4, %v580_v17  ;;  %v1591_v22 = vpop.f32.mrb[3].mxu1 }
  0xf4   : > { %v2732_v23 = vpack.c.bf16 %v834_v13, %v834_v13  ;;  %v1843_v24 = vmax.f32 %v1589_v14, 0.0  ;;  %v835_v25 = vmax.f32 %v589_v15, 0.0  ;;  %v1592_v26 = vadd.f32 %v3498_v4, %v1591_v22 }
  0xf5   : > { %v2796_v27 = vpack.c.bf16 %v1845_v18, %v1845_v18  ;;  %v2730_v28 = vpack.c.bf16 %v832_v19, %v832_v19  ;;  %v1846_v29 = vmax.f32 %v1600_v20, 0.0  ;;  %v833_v30 = vmax.f32 %v581_v21, 0.0 }
  0xf6   : > { %1155 = vst.msk [vmem:[%s3510_s26 + $0x8] sm:$0xf] %vm1152_vm1, %v2732_v23  ;;  %v2794_v31 = vpack.c.bf16 %v1843_v24, %v1843_v24  ;;  %v2733_v32 = vpack.c.bf16 %v835_v25, %v835_v25  ;;  %v1844_v33 = vmax.f32 %v1592_v26, 0.0 }
  0xf7   : > { %2662 = vst.msk [vmem:[%s3510_s26 + $0x108] sm:$0xf] %vm1152_vm1, %v2796_v27  ;;  %1153 = vst.msk [vmem:[%s3510_s26] sm:$0xf] %vm1152_vm1, %v2730_v28  ;;  %v2797_v34 = vpack.c.bf16 %v1846_v29, %v1846_v29  ;;  %v2731_v35 = vpack.c.bf16 %v833_v30, %v833_v30  ;;  %v2937_v36 = vpop.f32.mrb[4].mxu0 }
  0xf8   : > { %2660 = vst.msk [vmem:[%s3510_s26 + $0x100] sm:$0xf] %vm1152_vm1, %v2794_v31  ;;  %1156 = vst.msk [vmem:[%s3510_s26 + $0xc] sm:$0xf] %vm1152_vm1, %v2733_v32  ;;  %v2795_v37 = vpack.c.bf16 %v1844_v33, %v1844_v33  ;;  %v602_v38 = vadd.f32 %v2937_v36, %v3498_v4  ;;  %v3005_v39 = vpop.f32.mrb[4].mxu1  ;;  %v593_v40 = vpop.f32.mrb[5].mxu0 }
  0xf9   : > { %2663 = vst.msk [vmem:[%s3510_s26 + $0x10c] sm:$0xf] %vm1152_vm1, %v2797_v34  ;;  %1154 = vst.msk [vmem:[%s3510_s26 + $0x4] sm:$0xf] %vm1152_vm1, %v2731_v35  ;;  %v1613_v41 = vadd.f32 %v3005_v39, %v3498_v4  ;;  %v594_v42 = vadd.f32 %v3498_v4, %v593_v40  ;;  %v1604_v43 = vpop.f32.mrb[5].mxu1  ;;  %v2938_v44 = vpop.f32.mrb[6].mxu0 }
  0xfa   : > { %2661 = vst.msk [vmem:[%s3510_s26 + $0x104] sm:$0xf] %vm1152_vm1, %v2795_v37  ;;  %v838_v45 = vmax.f32 %v602_v38, 0.0  ;;  %v1605_v46 = vadd.f32 %v3498_v4, %v1604_v43  ;;  %v605_v47 = vadd.f32 %v2938_v44, %v3498_v4  ;;  %v3006_v48 = vpop.f32.mrb[6].mxu1  ;;  %v596_v49 = vpop.f32.mrb[7].mxu0 }
  0xfb   : > { %v1849_v50 = vmax.f32 %v1613_v41, 0.0  ;;  %v836_v51 = vmax.f32 %v594_v42, 0.0  ;;  %v1616_v52 = vadd.f32 %v3006_v48, %v3498_v4  ;;  %v597_v53 = vadd.f32 %v3498_v4, %v596_v49  ;;  %v1607_v54 = vpop.f32.mrb[7].mxu1 }
  0xfc   : > { %v2736_v55 = vpack.c.bf16 %v838_v45, %v838_v45  ;;  %v1847_v56 = vmax.f32 %v1605_v46, 0.0  ;;  %v839_v57 = vmax.f32 %v605_v47, 0.0  ;;  %v1608_v58 = vadd.f32 %v3498_v4, %v1607_v54 }
  0xfd   : > { %v2800_v59 = vpack.c.bf16 %v1849_v50, %v1849_v50  ;;  %v2734_v60 = vpack.c.bf16 %v836_v51, %v836_v51  ;;  %v1850_v61 = vmax.f32 %v1616_v52, 0.0  ;;  %v837_v62 = vmax.f32 %v597_v53, 0.0 }
  0xfe   : > { %1159 = vst.msk [vmem:[%s3510_s26 + $0x18] sm:$0xf] %vm1152_vm1, %v2736_v55  ;;  %v2798_v63 = vpack.c.bf16 %v1847_v56, %v1847_v56  ;;  %v2737_v0 = vpack.c.bf16 %v839_v57, %v839_v57  ;;  %v1848_v1 = vmax.f32 %v1608_v58, 0.0 }
  0xff   : > { %2666 = vst.msk [vmem:[%s3510_s26 + $0x118] sm:$0xf] %vm1152_vm1, %v2800_v59  ;;  %1157 = vst.msk [vmem:[%s3510_s26 + $0x10] sm:$0xf] %vm1152_vm1, %v2734_v60  ;;  %v2801_v2 = vpack.c.bf16 %v1850_v61, %v1850_v61  ;;  %v2735_v3 = vpack.c.bf16 %v837_v62, %v837_v62  ;;  %v2941_v5 = vpop.f32.mrb[8].mxu0 }
 0x100   : > { %2664 = vst.msk [vmem:[%s3510_s26 + $0x110] sm:$0xf] %vm1152_vm1, %v2798_v63  ;;  %1160 = vst.msk [vmem:[%s3510_s26 + $0x1c] sm:$0xf] %vm1152_vm1, %v2737_v0  ;;  %v2799_v6 = vpack.c.bf16 %v1848_v1, %v1848_v1  ;;  %v618_v7 = vadd.f32 %v2941_v5, %v3498_v4  ;;  %v3009_v8 = vpop.f32.mrb[8].mxu1  ;;  %v609_v9 = vpop.f32.mrb[9].mxu0 }
 0x101   : > { %2667 = vst.msk [vmem:[%s3510_s26 + $0x11c] sm:$0xf] %vm1152_vm1, %v2801_v2  ;;  %1158 = vst.msk [vmem:[%s3510_s26 + $0x14] sm:$0xf] %vm1152_vm1, %v2735_v3  ;;  %v1629_v10 = vadd.f32 %v3009_v8, %v3498_v4  ;;  %v610_v11 = vadd.f32 %v3498_v4, %v609_v9  ;;  %v1620_v12 = vpop.f32.mrb[9].mxu1  ;;  %v2942_v13 = vpop.f32.mrb[10].mxu0 }
 0x102   : > { %2665 = vst.msk [vmem:[%s3510_s26 + $0x114] sm:$0xf] %vm1152_vm1, %v2799_v6  ;;  %v842_v14 = vmax.f32 %v618_v7, 0.0  ;;  %v1621_v15 = vadd.f32 %v3498_v4, %v1620_v12  ;;  %v621_v16 = vadd.f32 %v2942_v13, %v3498_v4  ;;  %v3010_v17 = vpop.f32.mrb[10].mxu1  ;;  %v612_v18 = vpop.f32.mrb[11].mxu0 }
 0x103   : > { %v1853_v19 = vmax.f32 %v1629_v10, 0.0  ;;  %v840_v20 = vmax.f32 %v610_v11, 0.0  ;;  %v1632_v21 = vadd.f32 %v3010_v17, %v3498_v4  ;;  %v613_v22 = vadd.f32 %v3498_v4, %v612_v18  ;;  %v1623_v23 = vpop.f32.mrb[11].mxu1 }
 0x104   : > { %v2740_v24 = vpack.c.bf16 %v842_v14, %v842_v14  ;;  %v1851_v25 = vmax.f32 %v1621_v15, 0.0  ;;  %v843_v26 = vmax.f32 %v621_v16, 0.0  ;;  %v1624_v27 = vadd.f32 %v3498_v4, %v1623_v23 }
 0x105   : > { %v2804_v28 = vpack.c.bf16 %v1853_v19, %v1853_v19  ;;  %v2738_v29 = vpack.c.bf16 %v840_v20, %v840_v20  ;;  %v1854_v30 = vmax.f32 %v1632_v21, 0.0  ;;  %v841_v31 = vmax.f32 %v613_v22, 0.0 }
 0x106   : > { %1163 = vst.msk [vmem:[%s3510_s26 + $0x28] sm:$0xf] %vm1152_vm1, %v2740_v24  ;;  %v2802_v32 = vpack.c.bf16 %v1851_v25, %v1851_v25  ;;  %v2741_v33 = vpack.c.bf16 %v843_v26, %v843_v26  ;;  %v1852_v34 = vmax.f32 %v1624_v27, 0.0 }
 0x107   : > { %2670 = vst.msk [vmem:[%s3510_s26 + $0x128] sm:$0xf] %vm1152_vm1, %v2804_v28  ;;  %1161 = vst.msk [vmem:[%s3510_s26 + $0x20] sm:$0xf] %vm1152_vm1, %v2738_v29  ;;  %v2805_v35 = vpack.c.bf16 %v1854_v30, %v1854_v30  ;;  %v2739_v36 = vpack.c.bf16 %v841_v31, %v841_v31  ;;  %v2945_v37 = vpop.f32.mrb[12].mxu0 }
 0x108   : > { %2668 = vst.msk [vmem:[%s3510_s26 + $0x120] sm:$0xf] %vm1152_vm1, %v2802_v32  ;;  %1164 = vst.msk [vmem:[%s3510_s26 + $0x2c] sm:$0xf] %vm1152_vm1, %v2741_v33  ;;  %v2803_v38 = vpack.c.bf16 %v1852_v34, %v1852_v34  ;;  %v634_v39 = vadd.f32 %v2945_v37, %v3498_v4  ;;  %v3013_v40 = vpop.f32.mrb[12].mxu1  ;;  %v625_v41 = vpop.f32.mrb[13].mxu0 }
 0x109   : > { %2671 = vst.msk [vmem:[%s3510_s26 + $0x12c] sm:$0xf] %vm1152_vm1, %v2805_v35  ;;  %1162 = vst.msk [vmem:[%s3510_s26 + $0x24] sm:$0xf] %vm1152_vm1, %v2739_v36  ;;  %v1645_v42 = vadd.f32 %v3013_v40, %v3498_v4  ;;  %v626_v43 = vadd.f32 %v3498_v4, %v625_v41  ;;  %v1636_v44 = vpop.f32.mrb[13].mxu1  ;;  %v2946_v45 = vpop.f32.mrb[14].mxu0 }
 0x10a   : > { %2669 = vst.msk [vmem:[%s3510_s26 + $0x124] sm:$0xf] %vm1152_vm1, %v2803_v38  ;;  %v846_v46 = vmax.f32 %v634_v39, 0.0  ;;  %v1637_v47 = vadd.f32 %v3498_v4, %v1636_v44  ;;  %v637_v48 = vadd.f32 %v2946_v45, %v3498_v4  ;;  %v3014_v49 = vpop.f32.mrb[14].mxu1  ;;  %v628_v50 = vpop.f32.mrb[15].mxu0 }
 0x10b   : > { %v1857_v51 = vmax.f32 %v1645_v42, 0.0  ;;  %v844_v52 = vmax.f32 %v626_v43, 0.0  ;;  %v1648_v53 = vadd.f32 %v3014_v49, %v3498_v4  ;;  %v629_v54 = vadd.f32 %v3498_v4, %v628_v50  ;;  %v1639_v55 = vpop.f32.mrb[15].mxu1 }
 0x10c   : > { %v2744_v56 = vpack.c.bf16 %v846_v46, %v846_v46  ;;  %v1855_v57 = vmax.f32 %v1637_v47, 0.0  ;;  %v847_v58 = vmax.f32 %v637_v48, 0.0  ;;  %v1640_v59 = vadd.f32 %v3498_v4, %v1639_v55 }
 0x10d   : > { %v2808_v60 = vpack.c.bf16 %v1857_v51, %v1857_v51  ;;  %v2742_v61 = vpack.c.bf16 %v844_v52, %v844_v52  ;;  %v1858_v62 = vmax.f32 %v1648_v53, 0.0  ;;  %v845_v63 = vmax.f32 %v629_v54, 0.0 }
 0x10e   : > { %1167 = vst.msk [vmem:[%s3510_s26 + $0x38] sm:$0xf] %vm1152_vm1, %v2744_v56  ;;  %v2806_v0 = vpack.c.bf16 %v1855_v57, %v1855_v57  ;;  %v2745_v1 = vpack.c.bf16 %v847_v58, %v847_v58  ;;  %v1856_v2 = vmax.f32 %v1640_v59, 0.0 }
 0x10f   : > { %2674 = vst.msk [vmem:[%s3510_s26 + $0x138] sm:$0xf] %vm1152_vm1, %v2808_v60  ;;  %1165 = vst.msk [vmem:[%s3510_s26 + $0x30] sm:$0xf] %vm1152_vm1, %v2742_v61  ;;  %v2809_v3 = vpack.c.bf16 %v1858_v62, %v1858_v62  ;;  %v2743_v5 = vpack.c.bf16 %v845_v63, %v845_v63  ;;  %v2949_v6 = vpop.f32.mrb[16].mxu0 }
 0x110   : > { %2672 = vst.msk [vmem:[%s3510_s26 + $0x130] sm:$0xf] %vm1152_vm1, %v2806_v0  ;;  %1168 = vst.msk [vmem:[%s3510_s26 + $0x3c] sm:$0xf] %vm1152_vm1, %v2745_v1  ;;  %v2807_v7 = vpack.c.bf16 %v1856_v2, %v1856_v2  ;;  %v650_v8 = vadd.f32 %v2949_v6, %v3498_v4  ;;  %v3017_v9 = vpop.f32.mrb[16].mxu1  ;;  %v641_v10 = vpop.f32.mrb[17].mxu0 }
 0x111   : > { %2675 = vst.msk [vmem:[%s3510_s26 + $0x13c] sm:$0xf] %vm1152_vm1, %v2809_v3  ;;  %1166 = vst.msk [vmem:[%s3510_s26 + $0x34] sm:$0xf] %vm1152_vm1, %v2743_v5  ;;  %v1661_v11 = vadd.f32 %v3017_v9, %v3498_v4  ;;  %v642_v12 = vadd.f32 %v3498_v4, %v641_v10  ;;  %v1652_v13 = vpop.f32.mrb[17].mxu1  ;;  %v2950_v14 = vpop.f32.mrb[18].mxu0 }
 0x112   : > { %2673 = vst.msk [vmem:[%s3510_s26 + $0x134] sm:$0xf] %vm1152_vm1, %v2807_v7  ;;  %v850_v15 = vmax.f32 %v650_v8, 0.0  ;;  %v1653_v16 = vadd.f32 %v3498_v4, %v1652_v13  ;;  %v653_v17 = vadd.f32 %v2950_v14, %v3498_v4  ;;  %v3018_v18 = vpop.f32.mrb[18].mxu1  ;;  %v644_v19 = vpop.f32.mrb[19].mxu0 }
 0x113   : > { %v1861_v20 = vmax.f32 %v1661_v11, 0.0  ;;  %v848_v21 = vmax.f32 %v642_v12, 0.0  ;;  %v1664_v22 = vadd.f32 %v3018_v18, %v3498_v4  ;;  %v645_v23 = vadd.f32 %v3498_v4, %v644_v19  ;;  %v1655_v24 = vpop.f32.mrb[19].mxu1 }
 0x114   : > { %v2748_v25 = vpack.c.bf16 %v850_v15, %v850_v15  ;;  %v1859_v26 = vmax.f32 %v1653_v16, 0.0  ;;  %v851_v27 = vmax.f32 %v653_v17, 0.0  ;;  %v1656_v28 = vadd.f32 %v3498_v4, %v1655_v24 }
 0x115   : > { %v2812_v29 = vpack.c.bf16 %v1861_v20, %v1861_v20  ;;  %v2746_v30 = vpack.c.bf16 %v848_v21, %v848_v21  ;;  %v1862_v31 = vmax.f32 %v1664_v22, 0.0  ;;  %v849_v32 = vmax.f32 %v645_v23, 0.0 }
 0x116   : > { %1171 = vst.msk [vmem:[%s3510_s26 + $0x48] sm:$0xf] %vm1152_vm1, %v2748_v25  ;;  %v2810_v33 = vpack.c.bf16 %v1859_v26, %v1859_v26  ;;  %v2749_v34 = vpack.c.bf16 %v851_v27, %v851_v27  ;;  %v1860_v35 = vmax.f32 %v1656_v28, 0.0 }
 0x117   : > { %2678 = vst.msk [vmem:[%s3510_s26 + $0x148] sm:$0xf] %vm1152_vm1, %v2812_v29  ;;  %1169 = vst.msk [vmem:[%s3510_s26 + $0x40] sm:$0xf] %vm1152_vm1, %v2746_v30  ;;  %v2813_v36 = vpack.c.bf16 %v1862_v31, %v1862_v31  ;;  %v2747_v37 = vpack.c.bf16 %v849_v32, %v849_v32  ;;  %v2953_v38 = vpop.f32.mrb[20].mxu0 }
 0x118   : > { %2676 = vst.msk [vmem:[%s3510_s26 + $0x140] sm:$0xf] %vm1152_vm1, %v2810_v33  ;;  %1172 = vst.msk [vmem:[%s3510_s26 + $0x4c] sm:$0xf] %vm1152_vm1, %v2749_v34  ;;  %v2811_v39 = vpack.c.bf16 %v1860_v35, %v1860_v35  ;;  %v666_v40 = vadd.f32 %v2953_v38, %v3498_v4  ;;  %v3021_v41 = vpop.f32.mrb[20].mxu1  ;;  %v657_v42 = vpop.f32.mrb[21].mxu0 }
 0x119   : > { %2679 = vst.msk [vmem:[%s3510_s26 + $0x14c] sm:$0xf] %vm1152_vm1, %v2813_v36  ;;  %1170 = vst.msk [vmem:[%s3510_s26 + $0x44] sm:$0xf] %vm1152_vm1, %v2747_v37  ;;  %v1677_v43 = vadd.f32 %v3021_v41, %v3498_v4  ;;  %v658_v44 = vadd.f32 %v3498_v4, %v657_v42  ;;  %v1668_v45 = vpop.f32.mrb[21].mxu1  ;;  %v2954_v46 = vpop.f32.mrb[22].mxu0 }
 0x11a   : > { %2677 = vst.msk [vmem:[%s3510_s26 + $0x144] sm:$0xf] %vm1152_vm1, %v2811_v39  ;;  %v854_v47 = vmax.f32 %v666_v40, 0.0  ;;  %v1669_v48 = vadd.f32 %v3498_v4, %v1668_v45  ;;  %v669_v49 = vadd.f32 %v2954_v46, %v3498_v4  ;;  %v3022_v50 = vpop.f32.mrb[22].mxu1  ;;  %v660_v51 = vpop.f32.mrb[23].mxu0 }
 0x11b   : > { %v1865_v52 = vmax.f32 %v1677_v43, 0.0  ;;  %v852_v53 = vmax.f32 %v658_v44, 0.0  ;;  %v1680_v54 = vadd.f32 %v3022_v50, %v3498_v4  ;;  %v661_v55 = vadd.f32 %v3498_v4, %v660_v51  ;;  %v1671_v56 = vpop.f32.mrb[23].mxu1 }
 0x11c   : > { %v2752_v57 = vpack.c.bf16 %v854_v47, %v854_v47  ;;  %v1863_v58 = vmax.f32 %v1669_v48, 0.0  ;;  %v855_v59 = vmax.f32 %v669_v49, 0.0  ;;  %v1672_v60 = vadd.f32 %v3498_v4, %v1671_v56 }
 0x11d   : > { %v2816_v61 = vpack.c.bf16 %v1865_v52, %v1865_v52  ;;  %v2750_v62 = vpack.c.bf16 %v852_v53, %v852_v53  ;;  %v1866_v63 = vmax.f32 %v1680_v54, 0.0  ;;  %v853_v0 = vmax.f32 %v661_v55, 0.0 }
 0x11e   : > { %1175 = vst.msk [vmem:[%s3510_s26 + $0x58] sm:$0xf] %vm1152_vm1, %v2752_v57  ;;  %v2814_v1 = vpack.c.bf16 %v1863_v58, %v1863_v58  ;;  %v2753_v2 = vpack.c.bf16 %v855_v59, %v855_v59  ;;  %v1864_v3 = vmax.f32 %v1672_v60, 0.0 }
 0x11f   : > { %2682 = vst.msk [vmem:[%s3510_s26 + $0x158] sm:$0xf] %vm1152_vm1, %v2816_v61  ;;  %1173 = vst.msk [vmem:[%s3510_s26 + $0x50] sm:$0xf] %vm1152_vm1, %v2750_v62  ;;  %v2817_v5 = vpack.c.bf16 %v1866_v63, %v1866_v63  ;;  %v2751_v6 = vpack.c.bf16 %v853_v0, %v853_v0  ;;  %v2957_v7 = vpop.f32.mrb[24].mxu0 }
 0x120   : > { %2680 = vst.msk [vmem:[%s3510_s26 + $0x150] sm:$0xf] %vm1152_vm1, %v2814_v1  ;;  %1176 = vst.msk [vmem:[%s3510_s26 + $0x5c] sm:$0xf] %vm1152_vm1, %v2753_v2  ;;  %v2815_v8 = vpack.c.bf16 %v1864_v3, %v1864_v3  ;;  %v682_v9 = vadd.f32 %v2957_v7, %v3498_v4  ;;  %v3025_v10 = vpop.f32.mrb[24].mxu1  ;;  %v673_v11 = vpop.f32.mrb[25].mxu0 }
 0x121   : > { %2683 = vst.msk [vmem:[%s3510_s26 + $0x15c] sm:$0xf] %vm1152_vm1, %v2817_v5  ;;  %1174 = vst.msk [vmem:[%s3510_s26 + $0x54] sm:$0xf] %vm1152_vm1, %v2751_v6  ;;  %v1693_v12 = vadd.f32 %v3025_v10, %v3498_v4  ;;  %v674_v13 = vadd.f32 %v3498_v4, %v673_v11  ;;  %v1684_v14 = vpop.f32.mrb[25].mxu1  ;;  %v2958_v15 = vpop.f32.mrb[26].mxu0 }
 0x122   : > { %2681 = vst.msk [vmem:[%s3510_s26 + $0x154] sm:$0xf] %vm1152_vm1, %v2815_v8  ;;  %v858_v16 = vmax.f32 %v682_v9, 0.0  ;;  %v1685_v17 = vadd.f32 %v3498_v4, %v1684_v14  ;;  %v685_v18 = vadd.f32 %v2958_v15, %v3498_v4  ;;  %v3026_v19 = vpop.f32.mrb[26].mxu1  ;;  %v676_v20 = vpop.f32.mrb[27].mxu0 }
 0x123   : > { %v1869_v21 = vmax.f32 %v1693_v12, 0.0  ;;  %v856_v22 = vmax.f32 %v674_v13, 0.0  ;;  %v1696_v23 = vadd.f32 %v3026_v19, %v3498_v4  ;;  %v677_v24 = vadd.f32 %v3498_v4, %v676_v20  ;;  %v1687_v25 = vpop.f32.mrb[27].mxu1 }
 0x124   : > { %v2756_v26 = vpack.c.bf16 %v858_v16, %v858_v16  ;;  %v1867_v27 = vmax.f32 %v1685_v17, 0.0  ;;  %v859_v28 = vmax.f32 %v685_v18, 0.0  ;;  %v1688_v29 = vadd.f32 %v3498_v4, %v1687_v25 }
 0x125   : > { %v2820_v30 = vpack.c.bf16 %v1869_v21, %v1869_v21  ;;  %v2754_v31 = vpack.c.bf16 %v856_v22, %v856_v22  ;;  %v1870_v32 = vmax.f32 %v1696_v23, 0.0  ;;  %v857_v33 = vmax.f32 %v677_v24, 0.0 }
 0x126   : > { %1179 = vst.msk [vmem:[%s3510_s26 + $0x68] sm:$0xf] %vm1152_vm1, %v2756_v26  ;;  %v2818_v34 = vpack.c.bf16 %v1867_v27, %v1867_v27  ;;  %v2757_v35 = vpack.c.bf16 %v859_v28, %v859_v28  ;;  %v1868_v36 = vmax.f32 %v1688_v29, 0.0 }
 0x127   : > { %2686 = vst.msk [vmem:[%s3510_s26 + $0x168] sm:$0xf] %vm1152_vm1, %v2820_v30  ;;  %1177 = vst.msk [vmem:[%s3510_s26 + $0x60] sm:$0xf] %vm1152_vm1, %v2754_v31  ;;  %v2821_v37 = vpack.c.bf16 %v1870_v32, %v1870_v32  ;;  %v2755_v38 = vpack.c.bf16 %v857_v33, %v857_v33  ;;  %v2961_v39 = vpop.f32.mrb[28].mxu0 }
 0x128   : > { %2684 = vst.msk [vmem:[%s3510_s26 + $0x160] sm:$0xf] %vm1152_vm1, %v2818_v34  ;;  %1180 = vst.msk [vmem:[%s3510_s26 + $0x6c] sm:$0xf] %vm1152_vm1, %v2757_v35  ;;  %v2819_v40 = vpack.c.bf16 %v1868_v36, %v1868_v36  ;;  %v698_v41 = vadd.f32 %v2961_v39, %v3498_v4  ;;  %v3029_v42 = vpop.f32.mrb[28].mxu1  ;;  %v689_v43 = vpop.f32.mrb[29].mxu0 }
 0x129   : > { %2687 = vst.msk [vmem:[%s3510_s26 + $0x16c] sm:$0xf] %vm1152_vm1, %v2821_v37  ;;  %1178 = vst.msk [vmem:[%s3510_s26 + $0x64] sm:$0xf] %vm1152_vm1, %v2755_v38  ;;  %v1709_v44 = vadd.f32 %v3029_v42, %v3498_v4  ;;  %v690_v45 = vadd.f32 %v3498_v4, %v689_v43  ;;  %v1700_v46 = vpop.f32.mrb[29].mxu1  ;;  %v2962_v47 = vpop.f32.mrb[30].mxu0 }
 0x12a   : > { %2685 = vst.msk [vmem:[%s3510_s26 + $0x164] sm:$0xf] %vm1152_vm1, %v2819_v40  ;;  %v862_v48 = vmax.f32 %v698_v41, 0.0  ;;  %v1701_v49 = vadd.f32 %v3498_v4, %v1700_v46  ;;  %v701_v50 = vadd.f32 %v2962_v47, %v3498_v4  ;;  %v3030_v51 = vpop.f32.mrb[30].mxu1  ;;  %v692_v52 = vpop.f32.mrb[31].mxu0 }
 0x12b   : > { %v1873_v53 = vmax.f32 %v1709_v44, 0.0  ;;  %v860_v54 = vmax.f32 %v690_v45, 0.0  ;;  %v1712_v55 = vadd.f32 %v3030_v51, %v3498_v4  ;;  %v693_v56 = vadd.f32 %v3498_v4, %v692_v52  ;;  %v1703_v57 = vpop.f32.mrb[31].mxu1 }
 0x12c   : > { %v2760_v58 = vpack.c.bf16 %v862_v48, %v862_v48  ;;  %v1871_v59 = vmax.f32 %v1701_v49, 0.0  ;;  %v863_v60 = vmax.f32 %v701_v50, 0.0  ;;  %v1704_v61 = vadd.f32 %v3498_v4, %v1703_v57 }
 0x12d   : > { %v2824_v62 = vpack.c.bf16 %v1873_v53, %v1873_v53  ;;  %v2758_v63 = vpack.c.bf16 %v860_v54, %v860_v54  ;;  %v1874_v0 = vmax.f32 %v1712_v55, 0.0  ;;  %v861_v1 = vmax.f32 %v693_v56, 0.0 }
 0x12e   : > { %1183 = vst.msk [vmem:[%s3510_s26 + $0x78] sm:$0xf] %vm1152_vm1, %v2760_v58  ;;  %v2822_v2 = vpack.c.bf16 %v1871_v59, %v1871_v59  ;;  %v2761_v3 = vpack.c.bf16 %v863_v60, %v863_v60  ;;  %v1872_v5 = vmax.f32 %v1704_v61, 0.0 }
 0x12f   : > { %2690 = vst.msk [vmem:[%s3510_s26 + $0x178] sm:$0xf] %vm1152_vm1, %v2824_v62  ;;  %1181 = vst.msk [vmem:[%s3510_s26 + $0x70] sm:$0xf] %vm1152_vm1, %v2758_v63  ;;  %v2825_v6 = vpack.c.bf16 %v1874_v0, %v1874_v0  ;;  %v2759_v7 = vpack.c.bf16 %v861_v1, %v861_v1  ;;  %v2965_v8 = vpop.f32.mrb[32].mxu0 }
 0x130   : > { %2688 = vst.msk [vmem:[%s3510_s26 + $0x170] sm:$0xf] %vm1152_vm1, %v2822_v2  ;;  %1184 = vst.msk [vmem:[%s3510_s26 + $0x7c] sm:$0xf] %vm1152_vm1, %v2761_v3  ;;  %v2823_v9 = vpack.c.bf16 %v1872_v5, %v1872_v5  ;;  %v714_v10 = vadd.f32 %v2965_v8, %v3498_v4  ;;  %v3033_v11 = vpop.f32.mrb[32].mxu1  ;;  %v705_v12 = vpop.f32.mrb[33].mxu0 }
 0x131   : > { %2691 = vst.msk [vmem:[%s3510_s26 + $0x17c] sm:$0xf] %vm1152_vm1, %v2825_v6  ;;  %1182 = vst.msk [vmem:[%s3510_s26 + $0x74] sm:$0xf] %vm1152_vm1, %v2759_v7  ;;  %v1725_v13 = vadd.f32 %v3033_v11, %v3498_v4  ;;  %v706_v14 = vadd.f32 %v3498_v4, %v705_v12  ;;  %v1716_v15 = vpop.f32.mrb[33].mxu1  ;;  %v2966_v16 = vpop.f32.mrb[34].mxu0 }
 0x132   : > { %2689 = vst.msk [vmem:[%s3510_s26 + $0x174] sm:$0xf] %vm1152_vm1, %v2823_v9  ;;  %v866_v17 = vmax.f32 %v714_v10, 0.0  ;;  %v1717_v18 = vadd.f32 %v3498_v4, %v1716_v15  ;;  %v717_v19 = vadd.f32 %v2966_v16, %v3498_v4  ;;  %v3034_v20 = vpop.f32.mrb[34].mxu1  ;;  %v708_v21 = vpop.f32.mrb[35].mxu0 }
 0x133   : > { %v1877_v22 = vmax.f32 %v1725_v13, 0.0  ;;  %v864_v23 = vmax.f32 %v706_v14, 0.0  ;;  %v1728_v24 = vadd.f32 %v3034_v20, %v3498_v4  ;;  %v709_v25 = vadd.f32 %v3498_v4, %v708_v21  ;;  %v1719_v26 = vpop.f32.mrb[35].mxu1 }
 0x134   : > { %v2764_v27 = vpack.c.bf16 %v866_v17, %v866_v17  ;;  %v1875_v28 = vmax.f32 %v1717_v18, 0.0  ;;  %v867_v29 = vmax.f32 %v717_v19, 0.0  ;;  %v1720_v30 = vadd.f32 %v3498_v4, %v1719_v26 }
 0x135   : > { %v2828_v31 = vpack.c.bf16 %v1877_v22, %v1877_v22  ;;  %v2762_v32 = vpack.c.bf16 %v864_v23, %v864_v23  ;;  %v1878_v33 = vmax.f32 %v1728_v24, 0.0  ;;  %v865_v34 = vmax.f32 %v709_v25, 0.0 }
 0x136   : > { %1187 = vst.msk [vmem:[%s3510_s26 + $0x88] sm:$0xf] %vm1152_vm1, %v2764_v27  ;;  %v2826_v35 = vpack.c.bf16 %v1875_v28, %v1875_v28  ;;  %v2765_v36 = vpack.c.bf16 %v867_v29, %v867_v29  ;;  %v1876_v37 = vmax.f32 %v1720_v30, 0.0 }
 0x137   : > { %2694 = vst.msk [vmem:[%s3510_s26 + $0x188] sm:$0xf] %vm1152_vm1, %v2828_v31  ;;  %1185 = vst.msk [vmem:[%s3510_s26 + $0x80] sm:$0xf] %vm1152_vm1, %v2762_v32  ;;  %v2829_v38 = vpack.c.bf16 %v1878_v33, %v1878_v33  ;;  %v2763_v39 = vpack.c.bf16 %v865_v34, %v865_v34  ;;  %v2969_v40 = vpop.f32.mrb[36].mxu0 }
 0x138   : > { %2692 = vst.msk [vmem:[%s3510_s26 + $0x180] sm:$0xf] %vm1152_vm1, %v2826_v35  ;;  %1188 = vst.msk [vmem:[%s3510_s26 + $0x8c] sm:$0xf] %vm1152_vm1, %v2765_v36  ;;  %v2827_v41 = vpack.c.bf16 %v1876_v37, %v1876_v37  ;;  %v730_v42 = vadd.f32 %v2969_v40, %v3498_v4  ;;  %v3037_v43 = vpop.f32.mrb[36].mxu1  ;;  %v721_v44 = vpop.f32.mrb[37].mxu0 }
 0x139   : > { %2695 = vst.msk [vmem:[%s3510_s26 + $0x18c] sm:$0xf] %vm1152_vm1, %v2829_v38  ;;  %1186 = vst.msk [vmem:[%s3510_s26 + $0x84] sm:$0xf] %vm1152_vm1, %v2763_v39  ;;  %v1741_v45 = vadd.f32 %v3037_v43, %v3498_v4  ;;  %v722_v46 = vadd.f32 %v3498_v4, %v721_v44  ;;  %v1732_v47 = vpop.f32.mrb[37].mxu1  ;;  %v2970_v48 = vpop.f32.mrb[38].mxu0 }
 0x13a   : > { %2693 = vst.msk [vmem:[%s3510_s26 + $0x184] sm:$0xf] %vm1152_vm1, %v2827_v41  ;;  %v870_v49 = vmax.f32 %v730_v42, 0.0  ;;  %v1733_v50 = vadd.f32 %v3498_v4, %v1732_v47  ;;  %v733_v51 = vadd.f32 %v2970_v48, %v3498_v4  ;;  %v3038_v52 = vpop.f32.mrb[38].mxu1  ;;  %v724_v53 = vpop.f32.mrb[39].mxu0 }
 0x13b   : > { %v1881_v54 = vmax.f32 %v1741_v45, 0.0  ;;  %v868_v55 = vmax.f32 %v722_v46, 0.0  ;;  %v1744_v56 = vadd.f32 %v3038_v52, %v3498_v4  ;;  %v725_v57 = vadd.f32 %v3498_v4, %v724_v53  ;;  %v1735_v58 = vpop.f32.mrb[39].mxu1 }
 0x13c   : > { %v2768_v59 = vpack.c.bf16 %v870_v49, %v870_v49  ;;  %v1879_v60 = vmax.f32 %v1733_v50, 0.0  ;;  %v871_v61 = vmax.f32 %v733_v51, 0.0  ;;  %v1736_v62 = vadd.f32 %v3498_v4, %v1735_v58 }
 0x13d   : > { %v2832_v63 = vpack.c.bf16 %v1881_v54, %v1881_v54  ;;  %v2766_v0 = vpack.c.bf16 %v868_v55, %v868_v55  ;;  %v1882_v1 = vmax.f32 %v1744_v56, 0.0  ;;  %v869_v2 = vmax.f32 %v725_v57, 0.0 }
 0x13e   : > { %1191 = vst.msk [vmem:[%s3510_s26 + $0x98] sm:$0xf] %vm1152_vm1, %v2768_v59  ;;  %v2830_v3 = vpack.c.bf16 %v1879_v60, %v1879_v60  ;;  %v2769_v5 = vpack.c.bf16 %v871_v61, %v871_v61  ;;  %v1880_v6 = vmax.f32 %v1736_v62, 0.0 }
 0x13f   : > { %2698 = vst.msk [vmem:[%s3510_s26 + $0x198] sm:$0xf] %vm1152_vm1, %v2832_v63  ;;  %1189 = vst.msk [vmem:[%s3510_s26 + $0x90] sm:$0xf] %vm1152_vm1, %v2766_v0  ;;  %v2833_v7 = vpack.c.bf16 %v1882_v1, %v1882_v1  ;;  %v2767_v8 = vpack.c.bf16 %v869_v2, %v869_v2  ;;  %v2973_v9 = vpop.f32.mrb[40].mxu0 }
 0x140   : > { %2696 = vst.msk [vmem:[%s3510_s26 + $0x190] sm:$0xf] %vm1152_vm1, %v2830_v3  ;;  %1192 = vst.msk [vmem:[%s3510_s26 + $0x9c] sm:$0xf] %vm1152_vm1, %v2769_v5  ;;  %v2831_v10 = vpack.c.bf16 %v1880_v6, %v1880_v6  ;;  %v746_v11 = vadd.f32 %v2973_v9, %v3498_v4  ;;  %v3041_v12 = vpop.f32.mrb[40].mxu1  ;;  %v737_v13 = vpop.f32.mrb[41].mxu0 }
 0x141   : > { %2699 = vst.msk [vmem:[%s3510_s26 + $0x19c] sm:$0xf] %vm1152_vm1, %v2833_v7  ;;  %1190 = vst.msk [vmem:[%s3510_s26 + $0x94] sm:$0xf] %vm1152_vm1, %v2767_v8  ;;  %v1757_v14 = vadd.f32 %v3041_v12, %v3498_v4  ;;  %v738_v15 = vadd.f32 %v3498_v4, %v737_v13  ;;  %v1748_v16 = vpop.f32.mrb[41].mxu1  ;;  %v2974_v17 = vpop.f32.mrb[42].mxu0 }
 0x142   : > { %2697 = vst.msk [vmem:[%s3510_s26 + $0x194] sm:$0xf] %vm1152_vm1, %v2831_v10  ;;  %v874_v18 = vmax.f32 %v746_v11, 0.0  ;;  %v1749_v19 = vadd.f32 %v3498_v4, %v1748_v16  ;;  %v749_v20 = vadd.f32 %v2974_v17, %v3498_v4  ;;  %v3042_v21 = vpop.f32.mrb[42].mxu1  ;;  %v740_v22 = vpop.f32.mrb[43].mxu0 }
 0x143   : > { %v1885_v23 = vmax.f32 %v1757_v14, 0.0  ;;  %v872_v24 = vmax.f32 %v738_v15, 0.0  ;;  %v1760_v25 = vadd.f32 %v3042_v21, %v3498_v4  ;;  %v741_v26 = vadd.f32 %v3498_v4, %v740_v22  ;;  %v1751_v27 = vpop.f32.mrb[43].mxu1 }
 0x144   : > { %v2772_v28 = vpack.c.bf16 %v874_v18, %v874_v18  ;;  %v1883_v29 = vmax.f32 %v1749_v19, 0.0  ;;  %v875_v30 = vmax.f32 %v749_v20, 0.0  ;;  %v1752_v31 = vadd.f32 %v3498_v4, %v1751_v27 }
 0x145   : > { %v2836_v32 = vpack.c.bf16 %v1885_v23, %v1885_v23  ;;  %v2770_v33 = vpack.c.bf16 %v872_v24, %v872_v24  ;;  %v1886_v34 = vmax.f32 %v1760_v25, 0.0  ;;  %v873_v35 = vmax.f32 %v741_v26, 0.0 }
 0x146   : > { %1195 = vst.msk [vmem:[%s3510_s26 + $0xa8] sm:$0xf] %vm1152_vm1, %v2772_v28  ;;  %v2834_v36 = vpack.c.bf16 %v1883_v29, %v1883_v29  ;;  %v2773_v37 = vpack.c.bf16 %v875_v30, %v875_v30  ;;  %v1884_v38 = vmax.f32 %v1752_v31, 0.0 }
 0x147   : > { %2702 = vst.msk [vmem:[%s3510_s26 + $0x1a8] sm:$0xf] %vm1152_vm1, %v2836_v32  ;;  %1193 = vst.msk [vmem:[%s3510_s26 + $0xa0] sm:$0xf] %vm1152_vm1, %v2770_v33  ;;  %v2837_v39 = vpack.c.bf16 %v1886_v34, %v1886_v34  ;;  %v2771_v40 = vpack.c.bf16 %v873_v35, %v873_v35  ;;  %v2977_v41 = vpop.f32.mrb[44].mxu0 }
 0x148   : > { %2700 = vst.msk [vmem:[%s3510_s26 + $0x1a0] sm:$0xf] %vm1152_vm1, %v2834_v36  ;;  %1196 = vst.msk [vmem:[%s3510_s26 + $0xac] sm:$0xf] %vm1152_vm1, %v2773_v37  ;;  %v2835_v42 = vpack.c.bf16 %v1884_v38, %v1884_v38  ;;  %v762_v43 = vadd.f32 %v2977_v41, %v3498_v4  ;;  %v3045_v44 = vpop.f32.mrb[44].mxu1  ;;  %v753_v45 = vpop.f32.mrb[45].mxu0 }
 0x149   : > { %2703 = vst.msk [vmem:[%s3510_s26 + $0x1ac] sm:$0xf] %vm1152_vm1, %v2837_v39  ;;  %1194 = vst.msk [vmem:[%s3510_s26 + $0xa4] sm:$0xf] %vm1152_vm1, %v2771_v40  ;;  %v1773_v46 = vadd.f32 %v3045_v44, %v3498_v4  ;;  %v754_v47 = vadd.f32 %v3498_v4, %v753_v45  ;;  %v1764_v48 = vpop.f32.mrb[45].mxu1  ;;  %v2978_v49 = vpop.f32.mrb[46].mxu0 }
 0x14a   : > { %2701 = vst.msk [vmem:[%s3510_s26 + $0x1a4] sm:$0xf] %vm1152_vm1, %v2835_v42  ;;  %v878_v50 = vmax.f32 %v762_v43, 0.0  ;;  %v1765_v51 = vadd.f32 %v3498_v4, %v1764_v48  ;;  %v765_v52 = vadd.f32 %v2978_v49, %v3498_v4  ;;  %v3046_v53 = vpop.f32.mrb[46].mxu1  ;;  %v756_v54 = vpop.f32.mrb[47].mxu0 }
 0x14b   : > { %v1889_v55 = vmax.f32 %v1773_v46, 0.0  ;;  %v876_v56 = vmax.f32 %v754_v47, 0.0  ;;  %v1776_v57 = vadd.f32 %v3046_v53, %v3498_v4  ;;  %v757_v58 = vadd.f32 %v3498_v4, %v756_v54  ;;  %v1767_v59 = vpop.f32.mrb[47].mxu1  ;;  %v3813_v43 = vld [vmem:[%s3952_s2] ss:$0 sm:$0xff] }
 0x14c   : > { %v2776_v60 = vpack.c.bf16 %v878_v50, %v878_v50  ;;  %v1887_v61 = vmax.f32 %v1765_v51, 0.0  ;;  %v879_v62 = vmax.f32 %v765_v52, 0.0  ;;  %v1768_v63 = vadd.f32 %v3498_v4, %v1767_v59 }
 0x14d   : > { %v2840_v0 = vpack.c.bf16 %v1889_v55, %v1889_v55  ;;  %v2774_v1 = vpack.c.bf16 %v876_v56, %v876_v56  ;;  %v1890_v2 = vmax.f32 %v1776_v57, 0.0  ;;  %v877_v3 = vmax.f32 %v757_v58, 0.0 }
 0x14e   : > { %1199 = vst.msk [vmem:[%s3510_s26 + $0xb8] sm:$0xf] %vm1152_vm1, %v2776_v60  ;;  %v2838_v5 = vpack.c.bf16 %v1887_v61, %v1887_v61  ;;  %v2777_v6 = vpack.c.bf16 %v879_v62, %v879_v62  ;;  %v1888_v7 = vmax.f32 %v1768_v63, 0.0 }
 0x14f   : > { %2706 = vst.msk [vmem:[%s3510_s26 + $0x1b8] sm:$0xf] %vm1152_vm1, %v2840_v0  ;;  %1197 = vst.msk [vmem:[%s3510_s26 + $0xb0] sm:$0xf] %vm1152_vm1, %v2774_v1  ;;  %v2841_v8 = vpack.c.bf16 %v1890_v2, %v1890_v2  ;;  %v2775_v9 = vpack.c.bf16 %v877_v3, %v877_v3  ;;  %v2981_v10 = vpop.f32.mrb[48].mxu0 }
 0x150   : > { %2704 = vst.msk [vmem:[%s3510_s26 + $0x1b0] sm:$0xf] %vm1152_vm1, %v2838_v5  ;;  %1200 = vst.msk [vmem:[%s3510_s26 + $0xbc] sm:$0xf] %vm1152_vm1, %v2777_v6  ;;  %v2839_v11 = vpack.c.bf16 %v1888_v7, %v1888_v7  ;;  %v778_v12 = vadd.f32 %v2981_v10, %v3498_v4  ;;  %v3049_v13 = vpop.f32.mrb[48].mxu1  ;;  %v769_v14 = vpop.f32.mrb[49].mxu0 }
 0x151   : > { %2707 = vst.msk [vmem:[%s3510_s26 + $0x1bc] sm:$0xf] %vm1152_vm1, %v2841_v8  ;;  %1198 = vst.msk [vmem:[%s3510_s26 + $0xb4] sm:$0xf] %vm1152_vm1, %v2775_v9  ;;  %v1789_v15 = vadd.f32 %v3049_v13, %v3498_v4  ;;  %v770_v16 = vadd.f32 %v3498_v4, %v769_v14  ;;  %v1780_v17 = vpop.f32.mrb[49].mxu1  ;;  %v2982_v18 = vpop.f32.mrb[50].mxu0 }
 0x152   : > { %2705 = vst.msk [vmem:[%s3510_s26 + $0x1b4] sm:$0xf] %vm1152_vm1, %v2839_v11  ;;  %v882_v19 = vmax.f32 %v778_v12, 0.0  ;;  %v1781_v20 = vadd.f32 %v3498_v4, %v1780_v17  ;;  %v781_v21 = vadd.f32 %v2982_v18, %v3498_v4  ;;  %v3050_v22 = vpop.f32.mrb[50].mxu1  ;;  %v772_v23 = vpop.f32.mrb[51].mxu0 }
 0x153   : > { %v1893_v24 = vmax.f32 %v1789_v15, 0.0  ;;  %v880_v25 = vmax.f32 %v770_v16, 0.0  ;;  %v1792_v26 = vadd.f32 %v3050_v22, %v3498_v4  ;;  %v773_v27 = vadd.f32 %v3498_v4, %v772_v23  ;;  %v1783_v28 = vpop.f32.mrb[51].mxu1 }
 0x154   : > { %v2780_v29 = vpack.c.bf16 %v882_v19, %v882_v19  ;;  %v1891_v30 = vmax.f32 %v1781_v20, 0.0  ;;  %v883_v31 = vmax.f32 %v781_v21, 0.0  ;;  %v1784_v32 = vadd.f32 %v3498_v4, %v1783_v28 }
 0x155   : > { %v2844_v33 = vpack.c.bf16 %v1893_v24, %v1893_v24  ;;  %v2778_v34 = vpack.c.bf16 %v880_v25, %v880_v25  ;;  %v1894_v35 = vmax.f32 %v1792_v26, 0.0  ;;  %v881_v36 = vmax.f32 %v773_v27, 0.0 }
 0x156   : > { %1203 = vst.msk [vmem:[%s3510_s26 + $0xc8] sm:$0xf] %vm1152_vm1, %v2780_v29  ;;  %v2842_v37 = vpack.c.bf16 %v1891_v30, %v1891_v30  ;;  %v2781_v38 = vpack.c.bf16 %v883_v31, %v883_v31  ;;  %v1892_v39 = vmax.f32 %v1784_v32, 0.0 }
 0x157   : > { %2710 = vst.msk [vmem:[%s3510_s26 + $0x1c8] sm:$0xf] %vm1152_vm1, %v2844_v33  ;;  %1201 = vst.msk [vmem:[%s3510_s26 + $0xc0] sm:$0xf] %vm1152_vm1, %v2778_v34  ;;  %v2845_v40 = vpack.c.bf16 %v1894_v35, %v1894_v35  ;;  %v2779_v41 = vpack.c.bf16 %v881_v36, %v881_v36  ;;  %v2985_v42 = vpop.f32.mrb[52].mxu0 }
 0x158   : > { %2708 = vst.msk [vmem:[%s3510_s26 + $0x1c0] sm:$0xf] %vm1152_vm1, %v2842_v37  ;;  %1204 = vst.msk [vmem:[%s3510_s26 + $0xcc] sm:$0xf] %vm1152_vm1, %v2781_v38  ;;  %v2843_v4 = vpack.c.bf16 %v1892_v39, %v1892_v39  ;;  %v794_v44 = vadd.f32 %v3813_v43, %v2985_v42  ;;  %v3053_v45 = vpop.f32.mrb[52].mxu1  ;;  %v785_v46 = vpop.f32.mrb[53].mxu0 }
 0x159   : > { %2711 = vst.msk [vmem:[%s3510_s26 + $0x1cc] sm:$0xf] %vm1152_vm1, %v2845_v40  ;;  %1202 = vst.msk [vmem:[%s3510_s26 + $0xc4] sm:$0xf] %vm1152_vm1, %v2779_v41  ;;  %v1805_v47 = vadd.f32 %v3813_v43, %v3053_v45  ;;  %v786_v48 = vadd.f32 %v3813_v43, %v785_v46  ;;  %v1796_v49 = vpop.f32.mrb[53].mxu1  ;;  %v2986_v50 = vpop.f32.mrb[54].mxu0 }
 0x15a   : > { %2709 = vst.msk [vmem:[%s3510_s26 + $0x1c4] sm:$0xf] %vm1152_vm1, %v2843_v4  ;;  %v886_v51 = vmax.f32 %v794_v44, 0.0  ;;  %v1797_v52 = vadd.f32 %v3813_v43, %v1796_v49  ;;  %v797_v53 = vadd.f32 %v3813_v43, %v2986_v50  ;;  %v3054_v54 = vpop.f32.mrb[54].mxu1  ;;  %v788_v55 = vpop.f32.mrb[55].mxu0 }
 0x15b   : > { %v1897_v56 = vmax.f32 %v1805_v47, 0.0  ;;  %v884_v57 = vmax.f32 %v786_v48, 0.0  ;;  %v1808_v58 = vadd.f32 %v3813_v43, %v3054_v54  ;;  %v789_v59 = vadd.f32 %v3813_v43, %v788_v55  ;;  %v1799_v60 = vpop.f32.mrb[55].mxu1 }
 0x15c   : > { %v2784_v61 = vpack.c.bf16 %v886_v51, %v886_v51  ;;  %v1895_v62 = vmax.f32 %v1797_v52, 0.0  ;;  %v887_v63 = vmax.f32 %v797_v53, 0.0  ;;  %v1800_v0 = vadd.f32 %v3813_v43, %v1799_v60 }
 0x15d   : > { %v2848_v1 = vpack.c.bf16 %v1897_v56, %v1897_v56  ;;  %v2782_v2 = vpack.c.bf16 %v884_v57, %v884_v57  ;;  %v1898_v3 = vmax.f32 %v1808_v58, 0.0  ;;  %v885_v5 = vmax.f32 %v789_v59, 0.0 }
 0x15e   : > { %1207 = vst.msk [vmem:[%s3510_s26 + $0xd8] sm:$0xf] %vm1152_vm1, %v2784_v61  ;;  %v2846_v6 = vpack.c.bf16 %v1895_v62, %v1895_v62  ;;  %v2785_v7 = vpack.c.bf16 %v887_v63, %v887_v63  ;;  %v1896_v8 = vmax.f32 %v1800_v0, 0.0 }
 0x15f   : > { %2714 = vst.msk [vmem:[%s3510_s26 + $0x1d8] sm:$0xf] %vm1152_vm1, %v2848_v1  ;;  %1205 = vst.msk [vmem:[%s3510_s26 + $0xd0] sm:$0xf] %vm1152_vm1, %v2782_v2  ;;  %v2849_v9 = vpack.c.bf16 %v1898_v3, %v1898_v3  ;;  %v2783_v10 = vpack.c.bf16 %v885_v5, %v885_v5  ;;  %v2989_v11 = vpop.f32.mrb[56].mxu0 }
 0x160   : > { %2712 = vst.msk [vmem:[%s3510_s26 + $0x1d0] sm:$0xf] %vm1152_vm1, %v2846_v6  ;;  %1208 = vst.msk [vmem:[%s3510_s26 + $0xdc] sm:$0xf] %vm1152_vm1, %v2785_v7  ;;  %v2847_v12 = vpack.c.bf16 %v1896_v8, %v1896_v8  ;;  %v810_v13 = vadd.f32 %v3813_v43, %v2989_v11  ;;  %v3057_v14 = vpop.f32.mrb[56].mxu1  ;;  %v801_v15 = vpop.f32.mrb[57].mxu0 }
 0x161   : > { %2715 = vst.msk [vmem:[%s3510_s26 + $0x1dc] sm:$0xf] %vm1152_vm1, %v2849_v9  ;;  %1206 = vst.msk [vmem:[%s3510_s26 + $0xd4] sm:$0xf] %vm1152_vm1, %v2783_v10  ;;  %v1821_v16 = vadd.f32 %v3813_v43, %v3057_v14  ;;  %v802_v17 = vadd.f32 %v3813_v43, %v801_v15  ;;  %v1812_v18 = vpop.f32.mrb[57].mxu1  ;;  %v2990_v19 = vpop.f32.mrb[58].mxu0 }
 0x162   : > { %2713 = vst.msk [vmem:[%s3510_s26 + $0x1d4] sm:$0xf] %vm1152_vm1, %v2847_v12  ;;  %v890_v20 = vmax.f32 %v810_v13, 0.0  ;;  %v1813_v21 = vadd.f32 %v3813_v43, %v1812_v18  ;;  %v813_v22 = vadd.f32 %v3813_v43, %v2990_v19  ;;  %v3058_v23 = vpop.f32.mrb[58].mxu1  ;;  %v804_v24 = vpop.f32.mrb[59].mxu0 }
 0x163   : > { %v1901_v25 = vmax.f32 %v1821_v16, 0.0  ;;  %v888_v26 = vmax.f32 %v802_v17, 0.0  ;;  %v1824_v27 = vadd.f32 %v3813_v43, %v3058_v23  ;;  %v805_v28 = vadd.f32 %v3813_v43, %v804_v24  ;;  %v1815_v29 = vpop.f32.mrb[59].mxu1 }
 0x164   : > { %v2788_v30 = vpack.c.bf16 %v890_v20, %v890_v20  ;;  %v1899_v31 = vmax.f32 %v1813_v21, 0.0  ;;  %v891_v32 = vmax.f32 %v813_v22, 0.0  ;;  %v1816_v33 = vadd.f32 %v3813_v43, %v1815_v29 }
 0x165   : > { %v2852_v34 = vpack.c.bf16 %v1901_v25, %v1901_v25  ;;  %v2786_v35 = vpack.c.bf16 %v888_v26, %v888_v26  ;;  %v1902_v36 = vmax.f32 %v1824_v27, 0.0  ;;  %v889_v37 = vmax.f32 %v805_v28, 0.0 }
 0x166   : > { %1211 = vst.msk [vmem:[%s3510_s26 + $0xe8] sm:$0xf] %vm1152_vm1, %v2788_v30  ;;  %v2850_v38 = vpack.c.bf16 %v1899_v31, %v1899_v31  ;;  %v2789_v39 = vpack.c.bf16 %v891_v32, %v891_v32  ;;  %v1900_v40 = vmax.f32 %v1816_v33, 0.0 }
 0x167   : > { %2718 = vst.msk [vmem:[%s3510_s26 + $0x1e8] sm:$0xf] %vm1152_vm1, %v2852_v34  ;;  %1209 = vst.msk [vmem:[%s3510_s26 + $0xe0] sm:$0xf] %vm1152_vm1, %v2786_v35  ;;  %v2853_v41 = vpack.c.bf16 %v1902_v36, %v1902_v36  ;;  %v2787_v42 = vpack.c.bf16 %v889_v37, %v889_v37  ;;  %v2993_v4 = vpop.f32.mrb[60].mxu0 }
 0x168   : > { %2716 = vst.msk [vmem:[%s3510_s26 + $0x1e0] sm:$0xf] %vm1152_vm1, %v2850_v38  ;;  %1212 = vst.msk [vmem:[%s3510_s26 + $0xec] sm:$0xf] %vm1152_vm1, %v2789_v39  ;;  %v2851_v44 = vpack.c.bf16 %v1900_v40, %v1900_v40  ;;  %v826_v45 = vadd.f32 %v3813_v43, %v2993_v4  ;;  %v3061_v46 = vpop.f32.mrb[60].mxu1  ;;  %v817_v47 = vpop.f32.mrb[61].mxu0 }
 0x169   : > { %2719 = vst.msk [vmem:[%s3510_s26 + $0x1ec] sm:$0xf] %vm1152_vm1, %v2853_v41  ;;  %1210 = vst.msk [vmem:[%s3510_s26 + $0xe4] sm:$0xf] %vm1152_vm1, %v2787_v42  ;;  %v1837_v48 = vadd.f32 %v3813_v43, %v3061_v46  ;;  %v818_v49 = vadd.f32 %v3813_v43, %v817_v47  ;;  %v1828_v50 = vpop.f32.mrb[61].mxu1  ;;  %v2994_v51 = vpop.f32.mrb[62].mxu0 }
 0x16a   : > { %2717 = vst.msk [vmem:[%s3510_s26 + $0x1e4] sm:$0xf] %vm1152_vm1, %v2851_v44  ;;  %v894_v52 = vmax.f32 %v826_v45, 0.0  ;;  %v1829_v53 = vadd.f32 %v3813_v43, %v1828_v50  ;;  %v829_v54 = vadd.f32 %v3813_v43, %v2994_v51  ;;  %v3062_v55 = vpop.f32.mrb[62].mxu1  ;;  %v820_v56 = vpop.f32.mrb[63].mxu0 }
 0x16b   : > { %v1905_v57 = vmax.f32 %v1837_v48, 0.0  ;;  %v892_v58 = vmax.f32 %v818_v49, 0.0  ;;  %v1840_v59 = vadd.f32 %v3813_v43, %v3062_v55  ;;  %v821_v60 = vadd.f32 %v3813_v43, %v820_v56  ;;  %v1831_v61 = vpop.f32.mrb[63].mxu1 }
 0x16c   : > { %v2792_v62 = vpack.c.bf16 %v894_v52, %v894_v52  ;;  %v1903_v63 = vmax.f32 %v1829_v53, 0.0  ;;  %v895_v0 = vmax.f32 %v829_v54, 0.0  ;;  %v1832_v1 = vadd.f32 %v3813_v43, %v1831_v61 }
 0x16d   : > { %v2856_v2 = vpack.c.bf16 %v1905_v57, %v1905_v57  ;;  %v2790_v3 = vpack.c.bf16 %v892_v58, %v892_v58  ;;  %v1906_v5 = vmax.f32 %v1840_v59, 0.0  ;;  %v893_v6 = vmax.f32 %v821_v60, 0.0 }
 0x16e   : > { %1215 = vst.msk [vmem:[%s3510_s26 + $0xf8] sm:$0xf] %vm1152_vm1, %v2792_v62  ;;  %v2854_v7 = vpack.c.bf16 %v1903_v63, %v1903_v63  ;;  %v2793_v8 = vpack.c.bf16 %v895_v0, %v895_v0  ;;  %v1904_v9 = vmax.f32 %v1832_v1, 0.0 }
 0x16f   : > { %2722 = vst.msk [vmem:[%s3510_s26 + $0x1f8] sm:$0xf] %vm1152_vm1, %v2856_v2  ;;  %1213 = vst.msk [vmem:[%s3510_s26 + $0xf0] sm:$0xf] %vm1152_vm1, %v2790_v3  ;;  %v2857_v43 = vpack.c.bf16 %v1906_v5, %v1906_v5  ;;  %v2791_v10 = vpack.c.bf16 %v893_v6, %v893_v6 }
 0x170   : > { %2720 = vst.msk [vmem:[%s3510_s26 + $0x1f0] sm:$0xf] %vm1152_vm1, %v2854_v7  ;;  %1216 = vst.msk [vmem:[%s3510_s26 + $0xfc] sm:$0xf] %vm1152_vm1, %v2793_v8  ;;  %v2855_v11 = vpack.c.bf16 %v1904_v9, %v1904_v9 }
 0x171   : > { %2723 = vst.msk [vmem:[%s3510_s26 + $0x1fc] sm:$0xf] %vm1152_vm1, %v2857_v43  ;;  %1214 = vst.msk [vmem:[%s3510_s26 + $0xf4] sm:$0xf] %vm1152_vm1, %v2791_v10 }
 0x172   : > { %2721 = vst.msk [vmem:[%s3510_s26 + $0x1f4] sm:$0xf] %vm1152_vm1, %v2855_v11 }
 0x173   : > { %3202 = shalt.err (!%p3199_p5)
}
 0x174   : > { %s3203_s11 = scalar_lea.hbm %s3888_s5, 8192  ;;  %s3207_s21 = scalar_lea.hbm %s3953_s3, 16384 }
 0x175   : > { %p3204_p6 = scmp.ne.s32.totalorder %s3888_s5, %s3203_s11  ;;  %p3208_p10 = scmp.lt.u32.totalorder %s3888_s5, %s3953_s3 }
 0x176   : > { %p3209_p11 = scmp.lt.u32.totalorder %s3207_s21, %s3203_s11  ;;  %p3211_p13 = scmp.lt.u32.totalorder %s3203_s11, %s3888_s5 }
 0x177   : > { %p3205_p7 = pnand %p3204_p6, %p3332_p4 }
 0x178   : > { %p3210_p12 = por %p3209_p11, %p3208_p10 }
 0x179   : > { %p3206_p9 = pneg %p3205_p7 }
 0x17a   : > { %p3212_p0 = por %p3211_p13, %p3210_p12 }
 0x17c   : > { %p3213_p1 = pnand %p3212_p0, %p3206_p9 }
 0x17e   : > { %3216 = shalt.err (!%p3213_p1)
}
 0x17f   : > { %s3270_s27 = smov 64   ;;  %s3271_s28 = smov 4  }
 0x180   : > { %3063 = dma.vmem_to_hbm [thread:$0]  (%p3332_p4), %s3890_s30, 8192, %s3888_s5, %s3904_s6, %s3270_s27, %s3270_s27, %s3271_s28  }
 0x181 PF: > { %p3069_p2 = scmp.ge.s32.totalorder %s3267_s17, 2  ;;  %s2260_s29 = sand.u32 1, %s3247_s12  }
 0x182   : > { %s2261_s15 = scalar_lea.sflag [#allocation3], %s2260_s29 }
 0x183   : > { %p3066_p3 = pnand %p3069_p2, %p3339_p8 }
 0x185   : > { %3242 = dma.done.wait (!%p3066_p3), %s2261_s15, 8192  }
 0x186   : > { %3244 = vsyncadd (!%p3066_p3), %s2261_s15, 4294959104  ;;  %s16_s17 = sadd.s32 1, %s3267_s17   ;;  %s3956_s12 = smov %s3251_s13 }
 0x187   : > { %p13_p5 = scmp.ge.s32.totalorder %s16_s17, 4   ;;  %s3957_s13 = smov %s3255_s14 }
 0x188   : > { %s3958_s14 = smov %s3345_s25  ;;  %s3959_s15 = smov %s3263_s16 }
 0x189   : > { %s3960_s16 = smov %s3962_s20  ;;  %15 = sbr.rel (!%p13_p5) target bundleno = 4 (0x4), region = 69 }
 0x190   :  { %2266 = vsyncpa [#allocation3], 1 }
 0x191   :  { %2268 = vsyncpa [#allocation3 + $0x1], 1 }

</bundles_post_ra>
